<compile_context>
chip_gen: v7x
topology: tpu7x:2x2x1
jax: 0.10.0
libtpu: 0.0.40
codegen_flags: <defaults>
</compile_context>

<pallas_src>
import numpy as np
import jax
import jax.numpy as jnp
from jax.experimental import pallas as pl
from jax.experimental.pallas import tpu as pltpu

NEG_INF = -1e9  # plain Python float: inlined literal, NOT a captured jnp constant


def _vmem_limit_bytes():
    """Generation-aware scoped-VMEM limit (~3/4 of physical, clamped to [32, 96] MiB)."""
    mib = 1024 * 1024
    try:
        cap = pltpu.get_tpu_info().vmem_capacity_bytes  # 64 MiB on v7x, 128 MiB on v5e/v6e
        return int(min(max(cap * 3 // 4, 32 * mib), 96 * mib))
    except Exception:
        return 64 * mib


def _layer_norm(v, gamma, beta, eps=1e-5):
    # one-pass variance (E[x^2] - mean^2), clamped at 0 against f32 cancellation
    mu = jnp.mean(v, axis=-1, keepdims=True)
    msq = jnp.mean(v * v, axis=-1, keepdims=True)
    var = jnp.maximum(msq - mu * mu, 0.0)
    return (v - mu) * jax.lax.rsqrt(var + eps) * gamma + beta


def _pick_q_tile(L, cap=256):
    """Largest divisor of L that is a multiple of 8 and <= cap; else the full sequence."""
    for t in range(min(L, cap), 7, -1):
        if L % t == 0 and t % 8 == 0:
            return t
    return L


def _pick_tile(n, preferred=(512, 256, 128)):
    for t in preferred:
        if n % t == 0:
            return t
    return n  # small/odd sizes: one full block


# ---------------------------------------------------------------------------
# Decoder-layer kernel: MHA (+residual+LN) and FFN (+residual+LN) fused.
# grid = (batch, num_query_tiles); K/V are projected once per batch element
# into persistent VMEM scratch (q axis is "arbitrary") and reused per q tile.
# ---------------------------------------------------------------------------
def make_decoder_layer_kernel(num_heads, d_k, d_v, seq_len, q_tile, eps=1e-5):
    H, L, TQ = num_heads, seq_len, q_tile
    scale = float(1.0 / np.sqrt(d_k))  # Python float -> inlined literal

    def kernel(x_ref, pad_ref, wq_ref, wk_ref, wv_ref, wfc_ref,
               g1_ref, b1_ref, w1_ref, w2_ref, g2_ref, b2_ref,
               out_ref, k_sc, v_sc):
        qi = pl.program_id(1)

        # ---- K/V projected once per batch element, persisted head-major in VMEM scratch
        @pl.when(qi == 0)
        def _():
            xk_b = x_ref[0]                                          # (L, E) bf16
            k2 = jnp.dot(xk_b, wk_ref[...], preferred_element_type=jnp.float32)
            v2 = jnp.dot(xk_b, wv_ref[...], preferred_element_type=jnp.float32)
            k_sc[...] = jnp.transpose(k2.reshape(L, H, d_k), (1, 0, 2)).astype(jnp.bfloat16)
            v_sc[...] = jnp.transpose(v2.reshape(L, H, d_v), (1, 0, 2)).astype(jnp.bfloat16)

        # ---- query / residual tile
        if TQ == L:
            x_q = x_ref[0]                                           # (TQ, E) bf16
        else:
            q_start = pl.multiple_of(qi * TQ, TQ)
            x_q = x_ref[0, pl.ds(q_start, TQ), :]
        x_res = x_q.astype(jnp.float32)

        # Q projection with 1/sqrt(d_k) folded in (applied to the small (TQ, H*dk) tensor)
        q2 = jnp.dot(x_q, wq_ref[...], preferred_element_type=jnp.float32) * scale
        q3 = jnp.transpose(q2.reshape(TQ, H, d_k), (1, 0, 2)).astype(jnp.bfloat16)  # (H,TQ,dk)

        # ---- causal + pad mask built in-kernel (no (L, L) HBM traffic)
        row = qi * TQ + jax.lax.broadcasted_iota(jnp.int32, (TQ, L), 0)
        col = jax.lax.broadcasted_iota(jnp.int32, (TQ, L), 1)
        pad_row = pad_ref[0]                                          # (1, L) f32, 1.0 == pad
        masked = jnp.logical_or(col > row, pad_row > 0.5)             # (TQ, L)

        # ---- head-batched scaled-dot-product attention (f32 softmax math)
        scores = jnp.einsum('hqd,hkd->hqk', q3, k_sc[...],
                            preferred_element_type=jnp.float32)       # (H, TQ, L)
        scores = jnp.where(masked[None, :, :], NEG_INF, scores)       # masked_fill semantics
        m = jnp.max(scores, axis=-1, keepdims=True)
        e = jnp.exp(scores - m)                                       # in [0, 1]
        denom = jnp.sum(e, axis=-1, keepdims=True)
        inv = pl.reciprocal(denom, approx=True)                       # (H, TQ, 1), EUP

        ctx3 = jnp.einsum('hqk,hkd->hqd', e.astype(jnp.bfloat16), v_sc[...],
                          preferred_element_type=jnp.float32) * inv   # normalize after PV
        ctx2 = jnp.transpose(ctx3, (1, 0, 2)).reshape(TQ, H * d_v)    # (TQ, H*dv)

        attn_out = jnp.dot(ctx2.astype(jnp.bfloat16), wfc_ref[...],
                           preferred_element_type=jnp.float32)        # (TQ, E)

        # dropout(p=0.1) is identity in eval mode
        y = _layer_norm(attn_out + x_res, g1_ref[...], b1_ref[...], eps)

        # ---- position-wise FFN
        h1 = jnp.maximum(jnp.dot(y.astype(jnp.bfloat16), w1_ref[...],
                                 preferred_element_type=jnp.float32), 0.0)
        ffn = jnp.dot(h1.astype(jnp.bfloat16), w2_ref[...],
                      preferred_element_type=jnp.float32)
        z = _layer_norm(ffn + y, g2_ref[...], b2_ref[...], eps)

        out_ref[0] = z.astype(out_ref.dtype)

    return kernel


def decoder_layer(x, pad, p, cfg, vmem_limit):
    B, L, E = x.shape
    H, d_k, d_v = cfg["num_heads"], cfg["d_k"], cfg["d_v"]
    h_dk, h_dv = H * d_k, H * d_v
    d_ff = p["w1"].shape[1]
    TQ = _pick_q_tile(L)
    NQ = L // TQ
    kernel = make_decoder_layer_kernel(H, d_k, d_v, L, TQ)

    flops = (2 * B * L * E * (2 * h_dk + h_dv)        # Q, K, V projections
             + 2 * B * H * L * L * (d_k + d_v)        # scores + PV
             + 2 * B * L * h_dv * E                   # attention output projection
             + 4 * B * L * E * d_ff)                  # FFN (two matmuls)
    transc = B * H * L * L + B * H * L + 2 * B * L    # exp + reciprocal + rsqrt
    bytes_acc = (2 * 2 * B * L * E                    # bf16 activations in + out
                 + 4 * B * L                          # pad flags (f32)
                 + 2 * (2 * E * h_dk + 2 * E * h_dv + 2 * E * d_ff)  # bf16 weights
                 + 4 * 4 * E)                         # LN params (f32)

    return pl.pallas_call(
        kernel,
        out_shape=jax.ShapeDtypeStruct((B, L, E), jnp.bfloat16),
        grid=(B, NQ),
        in_specs=[
            pl.BlockSpec((1, L, E), lambda b, q: (b, 0, 0)),   # x (full sequence, bf16)
            pl.BlockSpec((1, 1, L), lambda b, q: (b, 0, 0)),   # pad flags (f32)
            pl.BlockSpec((E, h_dk), lambda b, q: (0, 0)),      # wq (bf16)
            pl.BlockSpec((E, h_dk), lambda b, q: (0, 0)),      # wk
            pl.BlockSpec((E, h_dv), lambda b, q: (0, 0)),      # wv
            pl.BlockSpec((h_dv, E), lambda b, q: (0, 0)),      # wfc
            pl.BlockSpec((1, E), lambda b, q: (0, 0)),         # ln1 gamma
            pl.BlockSpec((1, E), lambda b, q: (0, 0)),         # ln1 beta
            pl.BlockSpec((E, d_ff), lambda b, q: (0, 0)),      # ffn w1
            pl.BlockSpec((d_ff, E), lambda b, q: (0, 0)),      # ffn w2
            pl.BlockSpec((1, E), lambda b, q: (0, 0)),         # ln2 gamma
            pl.BlockSpec((1, E), lambda b, q: (0, 0)),         # ln2 beta
        ],
        out_specs=pl.BlockSpec((1, TQ, E), lambda b, q: (b, q, 0)),
        scratch_shapes=[pltpu.VMEM((H, L, d_k), jnp.bfloat16),   # K, head-major
                        pltpu.VMEM((H, L, d_v), jnp.bfloat16)],  # V, head-major
        compiler_params=pltpu.CompilerParams(
            dimension_semantics=("parallel", "arbitrary"),   # q axis reuses K/V scratch
            vmem_limit_bytes=vmem_limit),
        cost_estimate=pl.CostEstimate(flops=flops, transcendentals=transc,
                                      bytes_accessed=bytes_acc),
    )(x, pad, p["wq"], p["wk"], p["wv"], p["wfc"],
      p["g1"], p["b1"], p["w1"], p["w2"], p["g2"], p["b2"])


# ---------------------------------------------------------------------------
# Final vocab projection: bf16 input, vocab padded to a multiple of 128 so the
# output stores are lane-dense; tiled over (rows, vocab) with a parallel grid.
# ---------------------------------------------------------------------------
def projection_kernel(x_ref, w_ref, o_ref):
    o_ref[...] = jnp.dot(x_ref[...], w_ref[...], preferred_element_type=jnp.float32)


def projection(x, w_proj, vmem_limit):
    B, L, E = x.shape
    V = w_proj.shape[1]
    M = B * L
    xf = x.reshape(M, E).astype(jnp.bfloat16)

    V_pad = ((V + 127) // 128) * 128                 # lane-dense output width
    w = jnp.pad(w_proj, ((0, 0), (0, V_pad - V))) if V_pad != V else w_proj

    TM = _pick_tile(M)
    TV = _pick_tile(V_pad)
    out = pl.pallas_call(
        projection_kernel,
        out_shape=jax.ShapeDtypeStruct((M, V_pad), jnp.float32),
        grid=(M // TM, V_pad // TV),
        in_specs=[pl.BlockSpec((TM, E), lambda i, j: (i, 0)),
                  pl.BlockSpec((E, TV), lambda i, j: (0, j))],
        out_specs=pl.BlockSpec((TM, TV), lambda i, j: (i, j)),
        compiler_params=pltpu.CompilerParams(
            dimension_semantics=("parallel", "parallel"),
            vmem_limit_bytes=vmem_limit),
        cost_estimate=pl.CostEstimate(
            flops=2 * M * E * V_pad, transcendentals=0,
            bytes_accessed=2 * M * E + 2 * E * V_pad + 4 * M * V_pad),
    )(xf, w)
    return out[:, :V].reshape(B, L, V)


# ---------------------------------------------------------------------------
# Full Transformer forward (glue in plain JAX, hot path in Pallas)
# ---------------------------------------------------------------------------
def transformer_forward(x, params, cfg):
    B, L, E = x.shape
    t_emb = jnp.repeat(params["t_pos"], cfg["num_tokens"], axis=1)[:, :L, :]
    s_emb = jnp.tile(params["s_pos"], (1, cfg["num_frames"], 1))[:, :L, :]
    x = x + t_emb + s_emb

    # Pad flag per key token (1.0 == pad). As in the PyTorch module, computed AFTER adding
    # positional embeddings (pos-embs are zero-initialized there).
    pad = (x[:, :, 0] == 0.0).astype(jnp.float32)[:, None, :]   # (B, 1, L)

    vmem_limit = _vmem_limit_bytes()
    h = x.astype(jnp.bfloat16)                      # bf16 inter-layer activations
    for layer_p in params["layers"]:
        h = decoder_layer(h, pad, layer_p, cfg, vmem_limit)

    return projection(h, params["w_proj"], vmem_limit)


# Pure-JAX reference with the identical mixed-precision policy (bf16 MXU inputs and bf16
# inter-layer activations, f32 accumulation / softmax / LayerNorm) for a sanity check.
def reference_forward(x, params, cfg):
    B, L, E = x.shape
    H, d_k, d_v = cfg["num_heads"], cfg["d_k"], cfg["d_v"]
    bf16, f32 = jnp.bfloat16, jnp.float32

    t_emb = jnp.repeat(params["t_pos"], cfg["num_tokens"], axis=1)[:, :L, :]
    s_emb = jnp.tile(params["s_pos"], (1, cfg["num_frames"], 1))[:, :L, :]
    x = x + t_emb + s_emb
    causal = jnp.triu(jnp.ones((L, L), jnp.bool_), k=1)[None]
    pad = (x[:, :, 0] == 0.0)[:, None, :]
    mask = jnp.logical_or(causal, pad)                            # (B, L, L)

    def ln(v, g, b, eps=1e-5):
        mu = jnp.mean(v, -1, keepdims=True)
        var = jnp.mean((v - mu) ** 2, -1, keepdims=True)
        return (v - mu) * jax.lax.rsqrt(var + eps) * g + b

    def mm(a, w):
        return jnp.einsum('...ij,jk->...ik', a.astype(bf16), w,
                          preferred_element_type=f32)

    h = x.astype(bf16)
    for p in params["layers"]:
        resid = h.astype(f32)
        q = mm(h, p["wq"]).reshape(B, L, H, d_k).transpose(0, 2, 1, 3)
        k = mm(h, p["wk"]).reshape(B, L, H, d_k).transpose(0, 2, 1, 3)
        v = mm(h, p["wv"]).reshape(B, L, H, d_v).transpose(0, 2, 1, 3)
        s = jnp.einsum('bhqd,bhkd->bhqk', q.astype(bf16), k.astype(bf16),
                       preferred_element_type=f32) / np.sqrt(d_k)
        s = jnp.where(mask[:, None], -1e9, s)
        a = jax.nn.softmax(s, axis=-1)
        ctx = jnp.einsum('bhqk,bhkd->bhqd', a.astype(bf16), v.astype(bf16),
                         preferred_element_type=f32)
        ctx = ctx.transpose(0, 2, 1, 3).reshape(B, L, H * d_v)
        y = ln(mm(ctx, p["wfc"]) + resid, p["g1"], p["b1"])
        ff = mm(jnp.maximum(mm(y, p["w1"]), 0.0), p["w2"])
        h = ln(ff + y, p["g2"], p["b2"]).astype(bf16)
    return mm(h, params["w_proj"])


# ---------------------------------------------------------------------------
if __name__ == "__main__":
    cfg = dict(vocab_size=16, embed_dim=32, num_frames=4, num_tokens=4,
               num_layers=2, d_k=16, d_v=16, d_ff=64, num_heads=2)
    B, L, E = 2, 8, cfg["embed_dim"]          # seq_len <= num_frames * num_tokens

    key = jax.random.PRNGKey(0)
    ks = jax.random.split(key, 4 + 6 * cfg["num_layers"])
    ki = iter(ks)

    def winit(k, shape):
        w = jax.random.normal(k, shape, jnp.float32) / np.sqrt(shape[0])
        return w.astype(jnp.bfloat16)          # weights live in bf16

    params = {
        "t_pos": 0.02 * jax.random.normal(next(ki), (1, cfg["num_frames"], E), jnp.float32),
        "s_pos": 0.02 * jax.random.normal(next(ki), (1, cfg["num_tokens"], E), jnp.float32),
        "w_proj": winit(next(ki), (E, cfg["vocab_size"])),
        "layers": [],
    }
    for _ in range(cfg["num_layers"]):
        params["layers"].append({
            "wq": winit(next(ki), (E, cfg["num_heads"] * cfg["d_k"])),
            "wk": winit(next(ki), (E, cfg["num_heads"] * cfg["d_k"])),
            "wv": winit(next(ki), (E, cfg["num_heads"] * cfg["d_v"])),
            "wfc": winit(next(ki), (cfg["num_heads"] * cfg["d_v"], E)),
            "g1": jnp.ones((1, E), jnp.float32),
            "b1": jnp.zeros((1, E), jnp.float32),
            "w1": winit(next(ki), (E, cfg["d_ff"])),
            "w2": winit(next(ki), (cfg["d_ff"], E)),
            "g2": jnp.ones((1, E), jnp.float32),
            "b2": jnp.zeros((1, E), jnp.float32),
        })

    x = jax.random.normal(next(ki), (B, L, E), jnp.float32)

    y = jax.block_until_ready(transformer_forward(x, params, cfg))
    assert y.shape == (B, L, cfg["vocab_size"])

    y_ref = jax.block_until_ready(reference_forward(x, params, cfg))
    np.testing.assert_allclose(np.asarray(y), np.asarray(y_ref),
                               rtol=2e-2, atol=2e-2)

    print("KERNEL_OK")
</pallas_src>

<mosaic_0001>
module attributes {stable_mosaic.version = 11 : i64} {
  func.func @kernel(%arg0: i32, %arg1: i32, %arg2: memref<1x8x32xbf16, #tpu.memory_space<vmem>>, %arg3: memref<1x1x8xf32, #tpu.memory_space<vmem>>, %arg4: memref<32x32xbf16, #tpu.memory_space<vmem>>, %arg5: memref<32x32xbf16, #tpu.memory_space<vmem>>, %arg6: memref<32x32xbf16, #tpu.memory_space<vmem>>, %arg7: memref<32x32xbf16, #tpu.memory_space<vmem>>, %arg8: memref<1x32xf32, #tpu.memory_space<vmem>>, %arg9: memref<1x32xf32, #tpu.memory_space<vmem>>, %arg10: memref<32x64xbf16, #tpu.memory_space<vmem>>, %arg11: memref<64x32xbf16, #tpu.memory_space<vmem>>, %arg12: memref<1x32xf32, #tpu.memory_space<vmem>>, %arg13: memref<1x32xf32, #tpu.memory_space<vmem>>, %arg14: memref<1x8x32xbf16, #tpu.memory_space<vmem>>, %arg15: memref<2x8x16xbf16, #tpu.memory_space<vmem>>, %arg16: memref<2x8x16xbf16, #tpu.memory_space<vmem>>) attributes {dimension_semantics = [#tpu.dimension_semantics<parallel>, #tpu.dimension_semantics<arbitrary>], iteration_bounds = array<i64: 2, 1>, scalar_prefetch = 0 : i64, scratch_operands = 2 : i64, tpu.core_type = #tpu.core_type<tc>, window_params = [{transform_indices = @transform_0, window_bounds = array<i64: 1, 8, 32>}, {transform_indices = @transform_1, window_bounds = array<i64: 1, 1, 8>}, {pipeline_mode = #tpu.pipeline_mode<synchronous>, transform_indices = @transform_2, window_bounds = array<i64: 32, 32>}, {pipeline_mode = #tpu.pipeline_mode<synchronous>, transform_indices = @transform_3, window_bounds = array<i64: 32, 32>}, {pipeline_mode = #tpu.pipeline_mode<synchronous>, transform_indices = @transform_4, window_bounds = array<i64: 32, 32>}, {pipeline_mode = #tpu.pipeline_mode<synchronous>, transform_indices = @transform_5, window_bounds = array<i64: 32, 32>}, {pipeline_mode = #tpu.pipeline_mode<synchronous>, transform_indices = @transform_6, window_bounds = array<i64: 1, 32>}, {pipeline_mode = #tpu.pipeline_mode<synchronous>, transform_indices = @transform_7, window_bounds = array<i64: 1, 32>}, {pipeline_mode = #tpu.pipeline_mode<synchronous>, transform_indices = @transform_8, window_bounds = array<i64: 32, 64>}, {pipeline_mode = #tpu.pipeline_mode<synchronous>, transform_indices = @transform_9, window_bounds = array<i64: 64, 32>}, {pipeline_mode = #tpu.pipeline_mode<synchronous>, transform_indices = @transform_10, window_bounds = array<i64: 1, 32>}, {pipeline_mode = #tpu.pipeline_mode<synchronous>, transform_indices = @transform_11, window_bounds = array<i64: 1, 32>}, {transform_indices = @transform_12, window_bounds = array<i64: 1, 8, 32>}]} {
    %c0_i32 = arith.constant 0 : i32
    %0 = arith.cmpi eq, %arg1, %c0_i32 : i32
    %1 = arith.extui %0 : i1 to i32
    %c0_i32_0 = arith.constant 0 : i32
    %2 = arith.cmpi ne, %1, %c0_i32_0 : i32
    scf.if %2 {
      %c0_54 = arith.constant 0 : index
      %c0_55 = arith.constant 0 : index
      %c0_56 = arith.constant 0 : index
      %116 = vector.load %arg2[%c0_54, %c0_55, %c0_56] : memref<1x8x32xbf16, #tpu.memory_space<vmem>>, vector<1x8x32xbf16>
      %117 = vector.shape_cast %116 : vector<1x8x32xbf16> to vector<8x32xbf16>
      %c0_57 = arith.constant 0 : index
      %c0_58 = arith.constant 0 : index
      %118 = vector.load %arg5[%c0_57, %c0_58] : memref<32x32xbf16, #tpu.memory_space<vmem>>, vector<32x32xbf16>
      %cst_59 = arith.constant dense<0.000000e+00> : vector<8x32xf32>
      %119 = tpu.matmul %117, %118, %cst_59 {dimension_numbers = #tpu.dot_dimension_numbers<[1], [0], [0], [1], [0, 0, 1, 1], [], []>} : vector<8x32xbf16>, vector<32x32xbf16>, vector<8x32xf32> -> vector<8x32xf32>
      %c0_60 = arith.constant 0 : index
      %c0_61 = arith.constant 0 : index
      %120 = vector.load %arg6[%c0_60, %c0_61] : memref<32x32xbf16, #tpu.memory_space<vmem>>, vector<32x32xbf16>
      %cst_62 = arith.constant dense<0.000000e+00> : vector<8x32xf32>
      %121 = tpu.matmul %117, %120, %cst_62 {dimension_numbers = #tpu.dot_dimension_numbers<[1], [0], [0], [1], [0, 0, 1, 1], [], []>} : vector<8x32xbf16>, vector<32x32xbf16>, vector<8x32xf32> -> vector<8x32xf32>
      %122 = vector.shape_cast %119 : vector<8x32xf32> to vector<8x2x16xf32>
      %123 = tpu.transpose %122, [1, 0, 2] : vector<8x2x16xf32> -> vector<2x8x16xf32>
      %124 = arith.truncf %123 : vector<2x8x16xf32> to vector<2x8x16xbf16>
      %c0_63 = arith.constant 0 : index
      %c0_64 = arith.constant 0 : index
      %c0_65 = arith.constant 0 : index
      %125 = vector.load %arg15[%c0_63, %c0_64, %c0_65] : memref<2x8x16xbf16, #tpu.memory_space<vmem>>, vector<2x8x16xbf16>
      tpu.vector_store %arg15[%c0_63, %c0_64, %c0_65], %124 {strides = array<i32>} : memref<2x8x16xbf16, #tpu.memory_space<vmem>>, vector<2x8x16xbf16>,
      %126 = vector.shape_cast %121 : vector<8x32xf32> to vector<8x2x16xf32>
      %127 = tpu.transpose %126, [1, 0, 2] : vector<8x2x16xf32> -> vector<2x8x16xf32>
      %128 = arith.truncf %127 : vector<2x8x16xf32> to vector<2x8x16xbf16>
      %c0_66 = arith.constant 0 : index
      %c0_67 = arith.constant 0 : index
      %c0_68 = arith.constant 0 : index
      %129 = vector.load %arg16[%c0_66, %c0_67, %c0_68] : memref<2x8x16xbf16, #tpu.memory_space<vmem>>, vector<2x8x16xbf16>
      tpu.vector_store %arg16[%c0_66, %c0_67, %c0_68], %128 {strides = array<i32>} : memref<2x8x16xbf16, #tpu.memory_space<vmem>>, vector<2x8x16xbf16>,
    } else {
    }
    %c0 = arith.constant 0 : index
    %c0_1 = arith.constant 0 : index
    %c0_2 = arith.constant 0 : index
    %3 = vector.load %arg2[%c0, %c0_1, %c0_2] : memref<1x8x32xbf16, #tpu.memory_space<vmem>>, vector<1x8x32xbf16>
    %4 = vector.shape_cast %3 : vector<1x8x32xbf16> to vector<8x32xbf16>
    %5 = arith.extf %4 : vector<8x32xbf16> to vector<8x32xf32>
    %c0_3 = arith.constant 0 : index
    %c0_4 = arith.constant 0 : index
    %6 = vector.load %arg4[%c0_3, %c0_4] : memref<32x32xbf16, #tpu.memory_space<vmem>>, vector<32x32xbf16>
    %cst = arith.constant dense<0.000000e+00> : vector<8x32xf32>
    %7 = tpu.matmul %4, %6, %cst {dimension_numbers = #tpu.dot_dimension_numbers<[1], [0], [0], [1], [0, 0, 1, 1], [], []>} : vector<8x32xbf16>, vector<32x32xbf16>, vector<8x32xf32> -> vector<8x32xf32>
    %cst_5 = arith.constant 2.500000e-01 : f32
    %8 = vector.broadcast %cst_5 : f32 to vector<8x32xf32>
    %9 = arith.mulf %7, %8 : vector<8x32xf32>
    %10 = vector.shape_cast %9 : vector<8x32xf32> to vector<8x2x16xf32>
    %11 = tpu.transpose %10, [1, 0, 2] : vector<8x2x16xf32> -> vector<2x8x16xf32>
    %12 = arith.truncf %11 : vector<2x8x16xf32> to vector<2x8x16xbf16>
    %c8_i32 = arith.constant 8 : i32
    %13 = arith.muli %arg1, %c8_i32 : i32
    %14 = tpu.iota {dimensions = array<i32: 0>} : vector<8x8xi32>
    %15 = vector.broadcast %13 : i32 to vector<8x8xi32>
    %16 = arith.addi %15, %14 : vector<8x8xi32>
    %17 = tpu.iota {dimensions = array<i32: 1>} : vector<8x8xi32>
    %c0_6 = arith.constant 0 : index
    %c0_7 = arith.constant 0 : index
    %c0_8 = arith.constant 0 : index
    %18 = vector.load %arg3[%c0_6, %c0_7, %c0_8] : memref<1x1x8xf32, #tpu.memory_space<vmem>>, vector<1x1x8xf32>
    %19 = vector.shape_cast %18 : vector<1x1x8xf32> to vector<1x8xf32>
    %20 = arith.cmpi sgt, %17, %16 : vector<8x8xi32>
    %cst_9 = arith.constant 5.000000e-01 : f32
    %21 = vector.broadcast %cst_9 : f32 to vector<1x8xf32>
    %22 = arith.cmpf ogt, %19, %21 : vector<1x8xf32>
    %23 = vector.broadcast %22 : vector<1x8xi1> to vector<8x8xi1>
    %24 = arith.ori %20, %23 : vector<8x8xi1>
    %c0_10 = arith.constant 0 : index
    %c0_11 = arith.constant 0 : index
    %c0_12 = arith.constant 0 : index
    %25 = vector.load %arg15[%c0_10, %c0_11, %c0_12] : memref<2x8x16xbf16, #tpu.memory_space<vmem>>, vector<2x8x16xbf16>
    "tpu.trace_start"() <{level = 10 : i32, message = "hqd,hkd->hqk"}> : () -> ()
    %cst_13 = arith.constant dense<0.000000e+00> : vector<2x8x8xf32>
    %26 = tpu.matmul %12, %25, %cst_13 {dimension_numbers = #tpu.dot_dimension_numbers<[2], [2], [1], [1], [0, 0, 0, 1, 1, 1], [0], [0]>} : vector<2x8x16xbf16>, vector<2x8x16xbf16>, vector<2x8x8xf32> -> vector<2x8x8xf32>
    "tpu.trace_stop"() : () -> ()
    %27 = vector.shape_cast %24 : vector<8x8xi1> to vector<1x8x8xi1>
    %cst_14 = arith.constant -1.000000e+09 : f32
    %28 = vector.shape_cast %27 : vector<1x8x8xi1> to vector<1x8x8xi1>
    %29 = vector.broadcast %28 : vector<1x8x8xi1> to vector<2x8x8xi1>
    %30 = vector.broadcast %cst_14 : f32 to vector<2x8x8xf32>
    %31 = arith.select %29, %30, %26 : vector<2x8x8xi1>, vector<2x8x8xf32>
    %cst_15 = arith.constant dense<0xFF800000> : vector<2x8xf32>
    %32 = vector.multi_reduction <maximumf>, %31, %cst_15 [2] : vector<2x8x8xf32> to vector<2x8xf32>
    %33 = vector.shape_cast %32 : vector<2x8xf32> to vector<2x8x1xf32>
    %34 = vector.broadcast %33 : vector<2x8x1xf32> to vector<2x8x8xf32>
    %35 = arith.subf %31, %34 : vector<2x8x8xf32>
    %36 = math.exp %35 : vector<2x8x8xf32>
    %cst_16 = arith.constant dense<0.000000e+00> : vector<2x8xf32>
    %37 = vector.multi_reduction <add>, %36, %cst_16 [2] : vector<2x8x8xf32> to vector<2x8xf32>
    %38 = vector.shape_cast %37 : vector<2x8xf32> to vector<2x8x1xf32>
    %39 = tpu.reciprocal %38 {approx = true} : vector<2x8x1xf32> -> vector<2x8x1xf32>
    %40 = arith.truncf %36 : vector<2x8x8xf32> to vector<2x8x8xbf16>
    %c0_17 = arith.constant 0 : index
    %c0_18 = arith.constant 0 : index
    %c0_19 = arith.constant 0 : index
    %41 = vector.load %arg16[%c0_17, %c0_18, %c0_19] : memref<2x8x16xbf16, #tpu.memory_space<vmem>>, vector<2x8x16xbf16>
    "tpu.trace_start"() <{level = 10 : i32, message = "hqk,hkd->hqd"}> : () -> ()
    %cst_20 = arith.constant dense<0.000000e+00> : vector<2x8x16xf32>
    %42 = tpu.matmul %40, %41, %cst_20 {dimension_numbers = #tpu.dot_dimension_numbers<[2], [1], [1], [2], [0, 0, 0, 1, 1, 2], [0], [0]>} : vector<2x8x8xbf16>, vector<2x8x16xbf16>, vector<2x8x16xf32> -> vector<2x8x16xf32>
    "tpu.trace_stop"() : () -> ()
    %43 = vector.broadcast %39 : vector<2x8x1xf32> to vector<2x8x16xf32>
    %44 = arith.mulf %42, %43 : vector<2x8x16xf32>
    %45 = tpu.transpose %44, [1, 0, 2] : vector<2x8x16xf32> -> vector<8x2x16xf32>
    %46 = vector.shape_cast %45 : vector<8x2x16xf32> to vector<8x32xf32>
    %47 = arith.truncf %46 : vector<8x32xf32> to vector<8x32xbf16>
    %c0_21 = arith.constant 0 : index
    %c0_22 = arith.constant 0 : index
    %48 = vector.load %arg7[%c0_21, %c0_22] : memref<32x32xbf16, #tpu.memory_space<vmem>>, vector<32x32xbf16>
    %cst_23 = arith.constant dense<0.000000e+00> : vector<8x32xf32>
    %49 = tpu.matmul %47, %48, %cst_23 {dimension_numbers = #tpu.dot_dimension_numbers<[1], [0], [0], [1], [0, 0, 1, 1], [], []>} : vector<8x32xbf16>, vector<32x32xbf16>, vector<8x32xf32> -> vector<8x32xf32>
    %50 = arith.addf %49, %5 : vector<8x32xf32>
    %c0_24 = arith.constant 0 : index
    %c0_25 = arith.constant 0 : index
    %51 = vector.load %arg8[%c0_24, %c0_25] : memref<1x32xf32, #tpu.memory_space<vmem>>, vector<1x32xf32>
    %c0_26 = arith.constant 0 : index
    %c0_27 = arith.constant 0 : index
    %52 = vector.load %arg9[%c0_26, %c0_27] : memref<1x32xf32, #tpu.memory_space<vmem>>, vector<1x32xf32>
    %cst_28 = arith.constant dense<0.000000e+00> : vector<8xf32>
    %53 = vector.multi_reduction <add>, %50, %cst_28 [1] : vector<8x32xf32> to vector<8xf32>
    %54 = vector.shape_cast %53 : vector<8xf32> to vector<8x1xf32>
    %cst_29 = arith.constant 3.200000e+01 : f32
    %55 = vector.broadcast %cst_29 : f32 to vector<8x1xf32>
    %56 = arith.divf %54, %55 : vector<8x1xf32>
    %57 = arith.mulf %50, %50 : vector<8x32xf32>
    %cst_30 = arith.constant dense<0.000000e+00> : vector<8xf32>
    %58 = vector.multi_reduction <add>, %57, %cst_30 [1] : vector<8x32xf32> to vector<8xf32>
    %59 = vector.shape_cast %58 : vector<8xf32> to vector<8x1xf32>
    %cst_31 = arith.constant 3.200000e+01 : f32
    %60 = vector.broadcast %cst_31 : f32 to vector<8x1xf32>
    %61 = arith.divf %59, %60 : vector<8x1xf32>
    %62 = arith.mulf %56, %56 : vector<8x1xf32>
    %63 = arith.subf %61, %62 : vector<8x1xf32>
    %cst_32 = arith.constant 0.000000e+00 : f32
    %64 = vector.broadcast %cst_32 : f32 to vector<8x1xf32>
    %65 = arith.maximumf %63, %64 : vector<8x1xf32>
    %66 = vector.broadcast %56 : vector<8x1xf32> to vector<8x32xf32>
    %67 = arith.subf %50, %66 : vector<8x32xf32>
    %cst_33 = arith.constant 9.99999974E-6 : f32
    %68 = vector.broadcast %cst_33 : f32 to vector<8x1xf32>
    %69 = arith.addf %65, %68 : vector<8x1xf32>
    %70 = math.rsqrt %69 : vector<8x1xf32>
    %71 = vector.broadcast %70 : vector<8x1xf32> to vector<8x32xf32>
    %72 = arith.mulf %67, %71 : vector<8x32xf32>
    %73 = vector.broadcast %51 : vector<1x32xf32> to vector<8x32xf32>
    %74 = arith.mulf %72, %73 : vector<8x32xf32>
    %75 = vector.broadcast %52 : vector<1x32xf32> to vector<8x32xf32>
    %76 = arith.addf %74, %75 : vector<8x32xf32>
    %77 = arith.truncf %76 : vector<8x32xf32> to vector<8x32xbf16>
    %c0_34 = arith.constant 0 : index
    %c0_35 = arith.constant 0 : index
    %78 = vector.load %arg10[%c0_34, %c0_35] : memref<32x64xbf16, #tpu.memory_space<vmem>>, vector<32x64xbf16>
    %cst_36 = arith.constant dense<0.000000e+00> : vector<8x64xf32>
    %79 = tpu.matmul %77, %78, %cst_36 {dimension_numbers = #tpu.dot_dimension_numbers<[1], [0], [0], [1], [0, 0, 1, 1], [], []>} : vector<8x32xbf16>, vector<32x64xbf16>, vector<8x64xf32> -> vector<8x64xf32>
    %cst_37 = arith.constant 0.000000e+00 : f32
    %80 = vector.broadcast %cst_37 : f32 to vector<8x64xf32>
    %81 = arith.maximumf %79, %80 : vector<8x64xf32>
    %82 = arith.truncf %81 : vector<8x64xf32> to vector<8x64xbf16>
    %c0_38 = arith.constant 0 : index
    %c0_39 = arith.constant 0 : index
    %83 = vector.load %arg11[%c0_38, %c0_39] : memref<64x32xbf16, #tpu.memory_space<vmem>>, vector<64x32xbf16>
    %cst_40 = arith.constant dense<0.000000e+00> : vector<8x32xf32>
    %84 = tpu.matmul %82, %83, %cst_40 {dimension_numbers = #tpu.dot_dimension_numbers<[1], [0], [0], [1], [0, 0, 1, 1], [], []>} : vector<8x64xbf16>, vector<64x32xbf16>, vector<8x32xf32> -> vector<8x32xf32>
    %85 = arith.addf %84, %76 : vector<8x32xf32>
    %c0_41 = arith.constant 0 : index
    %c0_42 = arith.constant 0 : index
    %86 = vector.load %arg12[%c0_41, %c0_42] : memref<1x32xf32, #tpu.memory_space<vmem>>, vector<1x32xf32>
    %c0_43 = arith.constant 0 : index
    %c0_44 = arith.constant 0 : index
    %87 = vector.load %arg13[%c0_43, %c0_44] : memref<1x32xf32, #tpu.memory_space<vmem>>, vector<1x32xf32>
    %cst_45 = arith.constant dense<0.000000e+00> : vector<8xf32>
    %88 = vector.multi_reduction <add>, %85, %cst_45 [1] : vector<8x32xf32> to vector<8xf32>
    %89 = vector.shape_cast %88 : vector<8xf32> to vector<8x1xf32>
    %cst_46 = arith.constant 3.200000e+01 : f32
    %90 = vector.broadcast %cst_46 : f32 to vector<8x1xf32>
    %91 = arith.divf %89, %90 : vector<8x1xf32>
    %92 = arith.mulf %85, %85 : vector<8x32xf32>
    %cst_47 = arith.constant dense<0.000000e+00> : vector<8xf32>
    %93 = vector.multi_reduction <add>, %92, %cst_47 [1] : vector<8x32xf32> to vector<8xf32>
    %94 = vector.shape_cast %93 : vector<8xf32> to vector<8x1xf32>
    %cst_48 = arith.constant 3.200000e+01 : f32
    %95 = vector.broadcast %cst_48 : f32 to vector<8x1xf32>
    %96 = arith.divf %94, %95 : vector<8x1xf32>
    %97 = arith.mulf %91, %91 : vector<8x1xf32>
    %98 = arith.subf %96, %97 : vector<8x1xf32>
    %cst_49 = arith.constant 0.000000e+00 : f32
    %99 = vector.broadcast %cst_49 : f32 to vector<8x1xf32>
    %100 = arith.maximumf %98, %99 : vector<8x1xf32>
    %101 = vector.broadcast %91 : vector<8x1xf32> to vector<8x32xf32>
    %102 = arith.subf %85, %101 : vector<8x32xf32>
    %cst_50 = arith.constant 9.99999974E-6 : f32
    %103 = vector.broadcast %cst_50 : f32 to vector<8x1xf32>
    %104 = arith.addf %100, %103 : vector<8x1xf32>
    %105 = math.rsqrt %104 : vector<8x1xf32>
    %106 = vector.broadcast %105 : vector<8x1xf32> to vector<8x32xf32>
    %107 = arith.mulf %102, %106 : vector<8x32xf32>
    %108 = vector.broadcast %86 : vector<1x32xf32> to vector<8x32xf32>
    %109 = arith.mulf %107, %108 : vector<8x32xf32>
    %110 = vector.broadcast %87 : vector<1x32xf32> to vector<8x32xf32>
    %111 = arith.addf %109, %110 : vector<8x32xf32>
    %112 = arith.truncf %111 : vector<8x32xf32> to vector<8x32xbf16>
    %c0_51 = arith.constant 0 : index
    %c0_52 = arith.constant 0 : index
    %c0_53 = arith.constant 0 : index
    %113 = vector.load %arg14[%c0_51, %c0_52, %c0_53] : memref<1x8x32xbf16, #tpu.memory_space<vmem>>, vector<1x8x32xbf16>
    %114 = vector.shape_cast %113 : vector<1x8x32xbf16> to vector<8x32xbf16>
    %115 = vector.shape_cast %112 : vector<8x32xbf16> to vector<1x8x32xbf16>
    tpu.vector_store %arg14[%c0_51, %c0_52, %c0_53], %115 {strides = array<i32>} : memref<1x8x32xbf16, #tpu.memory_space<vmem>>, vector<1x8x32xbf16>,
    return
  }
  func.func @transform_0(%arg0: i32, %arg1: i32) -> (i32, i32, i32) {
    %c0_i32 = arith.constant 0 : i32
    %c0_i32_0 = arith.constant 0 : i32
    %c0_i32_1 = arith.constant 0 : i32
    return %arg0, %c0_i32, %c0_i32_0 : i32, i32, i32
  }
  func.func @transform_1(%arg0: i32, %arg1: i32) -> (i32, i32, i32) {
    %c0_i32 = arith.constant 0 : i32
    %c0_i32_0 = arith.constant 0 : i32
    %c0_i32_1 = arith.constant 0 : i32
    return %arg0, %c0_i32, %c0_i32_0 : i32, i32, i32
  }
  func.func @transform_2(%arg0: i32, %arg1: i32) -> (i32, i32) {
    %c0_i32 = arith.constant 0 : i32
    %c0_i32_0 = arith.constant 0 : i32
    %c0_i32_1 = arith.constant 0 : i32
    return %c0_i32, %c0_i32_0 : i32, i32
  }
  func.func @transform_3(%arg0: i32, %arg1: i32) -> (i32, i32) {
    %c0_i32 = arith.constant 0 : i32
    %c0_i32_0 = arith.constant 0 : i32
    %c0_i32_1 = arith.constant 0 : i32
    return %c0_i32, %c0_i32_0 : i32, i32
  }
  func.func @transform_4(%arg0: i32, %arg1: i32) -> (i32, i32) {
    %c0_i32 = arith.constant 0 : i32
    %c0_i32_0 = arith.constant 0 : i32
    %c0_i32_1 = arith.constant 0 : i32
    return %c0_i32, %c0_i32_0 : i32, i32
  }
  func.func @transform_5(%arg0: i32, %arg1: i32) -> (i32, i32) {
    %c0_i32 = arith.constant 0 : i32
    %c0_i32_0 = arith.constant 0 : i32
    %c0_i32_1 = arith.constant 0 : i32
    return %c0_i32, %c0_i32_0 : i32, i32
  }
  func.func @transform_6(%arg0: i32, %arg1: i32) -> (i32, i32) {
    %c0_i32 = arith.constant 0 : i32
    %c0_i32_0 = arith.constant 0 : i32
    %c0_i32_1 = arith.constant 0 : i32
    return %c0_i32, %c0_i32_0 : i32, i32
  }
  func.func @transform_7(%arg0: i32, %arg1: i32) -> (i32, i32) {
    %c0_i32 = arith.constant 0 : i32
    %c0_i32_0 = arith.constant 0 : i32
    %c0_i32_1 = arith.constant 0 : i32
    return %c0_i32, %c0_i32_0 : i32, i32
  }
  func.func @transform_8(%arg0: i32, %arg1: i32) -> (i32, i32) {
    %c0_i32 = arith.constant 0 : i32
    %c0_i32_0 = arith.constant 0 : i32
    %c0_i32_1 = arith.constant 0 : i32
    return %c0_i32, %c0_i32_0 : i32, i32
  }
  func.func @transform_9(%arg0: i32, %arg1: i32) -> (i32, i32) {
    %c0_i32 = arith.constant 0 : i32
    %c0_i32_0 = arith.constant 0 : i32
    %c0_i32_1 = arith.constant 0 : i32
    return %c0_i32, %c0_i32_0 : i32, i32
  }
  func.func @transform_10(%arg0: i32, %arg1: i32) -> (i32, i32) {
    %c0_i32 = arith.constant 0 : i32
    %c0_i32_0 = arith.constant 0 : i32
    %c0_i32_1 = arith.constant 0 : i32
    return %c0_i32, %c0_i32_0 : i32, i32
  }
  func.func @transform_11(%arg0: i32, %arg1: i32) -> (i32, i32) {
    %c0_i32 = arith.constant 0 : i32
    %c0_i32_0 = arith.constant 0 : i32
    %c0_i32_1 = arith.constant 0 : i32
    return %c0_i32, %c0_i32_0 : i32, i32
  }
  func.func @transform_12(%arg0: i32, %arg1: i32) -> (i32, i32, i32) {
    %c0_i32 = arith.constant 0 : i32
    %c0_i32_0 = arith.constant 0 : i32
    return %arg0, %arg1, %c0_i32 : i32, i32, i32
  }
}

</mosaic_0001>

<bundles_post_ra>
// kernel: tpu_custom_call.1
= control target key start
LH: loop header
LB: loop body
LE: loop exit
PB: predicated region body
PF: predicated region fallthrough
CT: control target
= control target key end

     0   :  { %s3547_s0 = inlined_call_operand.hbm [shape: bf16[2,8,32], index: 0, kind: input, shape index: {}]   ;;  %s3548_s1 = inlined_call_operand.hbm [shape: f32[2,1,8], index: 1, kind: input, shape index: {}]   ;;  %s3549_s2 = inlined_call_operand.hbm [shape: bf16[32,32], index: 2, kind: input, shape index: {}]   ;;  %s3550_s3 = inlined_call_operand.hbm [shape: bf16[32,32], index: 3, kind: input, shape index: {}]   ;;  %s3551_s4 = inlined_call_operand.hbm [shape: bf16[32,32], index: 4, kind: input, shape index: {}]   ;;  %s3552_s5 = inlined_call_operand.hbm [shape: bf16[32,32], index: 5, kind: input, shape index: {}]   ;;  %s3553_s6 = inlined_call_operand.hbm [shape: f32[1,32], index: 6, kind: input, shape index: {}]   ;;  %s3554_s7 = inlined_call_operand.hbm [shape: f32[1,32], index: 7, kind: input, shape index: {}]   ;;  %s3555_s8 = inlined_call_operand.hbm [shape: bf16[32,64], index: 8, kind: input, shape index: {}]   ;;  %s3556_s9 = inlined_call_operand.hbm [shape: bf16[64,32], index: 9, kind: input, shape index: {}]   ;;  %s3557_s10 = inlined_call_operand.hbm [shape: f32[1,32], index: 10, kind: input, shape index: {}]   ;;  %s3558_s11 = inlined_call_operand.hbm [shape: f32[1,32], index: 11, kind: input, shape index: {}]   ;;  %s3559_s12 = inlined_call_operand.hbm [shape: bf16[2,8,32], index: 12, kind: output, shape index: {}]  }
   0x1   :  { %3571 = sst [smem:[#allocation37_spill]] %s3547_s0 }
   0x2   :  { %3572 = sst [smem:[#allocation38_spill]] %s3548_s1 }
   0x3   :  { %3573 = sst [smem:[#allocation39_spill]] %s3549_s2 }
   0x4   :  { %3574 = sst [smem:[#allocation40_spill]] %s3550_s3 }
   0x5   :  { %3575 = sst [smem:[#allocation41_spill]] %s3551_s4 }
   0x6   :  { %3576 = sst [smem:[#allocation42_spill]] %s3552_s5 }
   0x7   :  { %3577 = sst [smem:[#allocation43_spill]] %s3553_s6 }
   0x8   :  { %3578 = sst [smem:[#allocation44_spill]] %s3559_s12 }
   0x9   :  { %17 = vsyncpa [#allocation5], 0 }
   0xa   :  { %19 = vsyncpa [#allocation5 + $0x1], 0 }
   0xb   :  { %20 = vsyncpa [#allocation8], 0 }
   0xc   :  { %22 = vsyncpa [#allocation8 + $0x1], 0 }
   0xd   :  { %23 = vsyncpa [#allocation11], 0 }
   0xe   :  { %24 = vsyncpa [#allocation14], 0 }
   0xf   :  { %25 = vsyncpa [#allocation17], 0 }
  0x10   :  { %26 = vsyncpa [#allocation20], 0 }
  0x11   :  { %27 = vsyncpa [#allocation23], 0 }
  0x12   :  { %28 = vsyncpa [#allocation6], 0 }
  0x13   :  { %30 = vsyncpa [#allocation6 + $0x1], 0  ;;  %s2918_s21 = smov 0   ;;  %s2920_s22 = smov 0  }
  0x14   :  { %s2922_s23 = smov 0   ;;  %s2924_s24 = smov 0  }
  0x15   :  { %s2926_s25 = smov 0   ;;  %s2928_s26 = smov 0  }
  0x16 LB: > { %3579 = sst [smem:[#allocation34_spill]] %s2821_s24  ;;  %s2949_s27 = sadd.s32 4294967295, %s2829_s26   ;;  %s2829_s26 = sphi %s2928_s26, %s36_s26   ;;  %s2825_s25 = sphi %s2926_s25, %s3625_s25   ;;  %s2821_s24 = sphi %s2924_s24, %s3624_s24   ;;  %s2817_s23 = sphi %s2922_s23, %s3623_s23   ;;  %s2813_s22 = sphi %s2920_s22, %s3622_s22   ;;  %s2809_s21 = sphi %s2918_s21, %s3621_s21  }
  0x17   : > { %3580 = sst [smem:[#allocation35_spill]] %s2949_s27  ;;  %p2004_p0 = scmp.ge.s32.totalorder %s2829_s26, 1 }
  0x18   : > { %p3567_p1 = scmp.eq.s32.totalorder %s2949_s27, 0  ;;  %p343_p2 = scmp.lt.s32.totalorder %s2829_s26, 3 }
  0x19   : > { %s2831_s29 = smov [#allocation9]   ;;  %s2832_s14 = smov [#allocation10]  }
  0x1a   : > { %p2954_p3 = pnand %p2004_p0, %p343_p2  ;;  %s355_s30 = sshll.u32 %s2831_s29, 4  ;;  %s2958_s30 = int_to_ptr.vmem [resolvable:$true] %s355_s30 }
  0x1b   : > { %s368_s15 = sshll.u32 %s2832_s14, 4  ;;  %s2833_s16 = smov [#allocation13]   ;;  %s2969_s15 = int_to_ptr.vmem [resolvable:$true] %s368_s15 }
  0x1c   : > { %s3581_s28 = scalar_select %p2954_p3, 1, 0 }
  0x1d   : > { %p2222_p4 = pneg %p2954_p3  ;;  %s2971_s17 = sshll.u32 %s2833_s16, 4  ;;  %s395_s17 = int_to_ptr.vmem [resolvable:$true] %s2971_s17 }
  0x1e   : > { %3582 = sst [smem:[#allocation36_spill]] %s3581_s28 }
  0x1f   : > { %p2965_p6 = pnand %p2222_p4, %p3567_p1  ;;  %s3584_s2 = sld [smem:[#allocation39_spill]] }
  0x21   : > { %p2981_p8 = pneg %p2965_p6 }
  0x25   : > { %s2379_s20 = scalar_lea.hbm %s3584_s2, 256 }
  0x26   : > { %p2380_p7 = scmp.ne.s32.totalorder %s3584_s2, %s2379_s20  ;;  %p2386_p11 = scmp.lt.u32.totalorder %s2379_s20, %s3584_s2 }
  0x28   : > { %p2382_p9 = pnand %p2981_p8, %p2380_p7 }
  0x2a   : > { %p2383_p10 = pneg %p2382_p9 }
  0x2c   : > { %p2388_p12 = pnand %p2386_p11, %p2383_p10 }
  0x2e   : > { %2391 = shalt.err (!%p2388_p12)
}
  0x2f   : > { %s2392_s12 = scalar_lea.vmem %s2958_s30, 256  ;;  %p2400_p4 = scmp.lt.s32.totalorder %s2958_s30, %s2958_s30 }
  0x30   : > { %p2393_p13 = scmp.ne.s32.totalorder %s2958_s30, %s2392_s12  ;;  %p2401_p5 = scmp.lt.s32.totalorder %s2392_s12, %s2392_s12 }
  0x32   : > { %p2395_p0 = pnand %p2393_p13, %p2981_p8  ;;  %p2402_p7 = por %p2401_p5, %p2400_p4 }
  0x34   : > { %p2396_p2 = pneg %p2395_p0 }
  0x36   : > { %p2403_p9 = pnand %p2402_p7, %p2396_p2 }
  0x38   : > { %2406 = shalt.err (!%p2403_p9)
}
  0x39   : > { %s2834_s18 = smov 64   ;;  %s2835_s19 = smov 4  }
  0x3a   : > { %2225 = dma.hbm_to_vmem [thread:$0]  (!%p2965_p6), %s3584_s2, 256, %s2958_s30, [#allocation8], %s2834_s18, %s2834_s18, %s2835_s19  }
  0x3b   : > { %s3586_s3 = sld [smem:[#allocation40_spill]] }
  0x41   : > { %s2407_s12 = scalar_lea.hbm %s3586_s3, 256 }
  0x42   : > { %p2408_p5 = scmp.ne.s32.totalorder %s3586_s3, %s2407_s12  ;;  %p2414_p12 = scmp.lt.u32.totalorder %s2407_s12, %s3586_s3 }
  0x44   : > { %p2410_p10 = pnand %p2408_p5, %p2981_p8 }
  0x46   : > { %p2411_p11 = pneg %p2410_p10 }
  0x48   : > { %p2416_p13 = pnand %p2414_p12, %p2411_p11 }
  0x4a   : > { %2419 = shalt.err (!%p2416_p13)
}
  0x4b   : > { %s2420_s30 = scalar_lea.vmem %s2969_s15, 256  ;;  %p2428_p7 = scmp.lt.s32.totalorder %s2969_s15, %s2969_s15 }
  0x4c   : > { %p2421_p0 = scmp.ne.s32.totalorder %s2969_s15, %s2420_s30  ;;  %p2429_p9 = scmp.lt.s32.totalorder %s2420_s30, %s2420_s30 }
  0x4e   : > { %p2423_p2 = pnand %p2421_p0, %p2981_p8  ;;  %p2430_p5 = por %p2429_p9, %p2428_p7 }
  0x50   : > { %p2424_p4 = pneg %p2423_p2 }
  0x52   : > { %p2431_p10 = pnand %p2430_p5, %p2424_p4 }
  0x54   : > { %2434 = shalt.err (!%p2431_p10)
}
  0x55   : > { %2228 = dma.hbm_to_vmem [thread:$0]  (!%p2965_p6), %s3586_s3, 256, %s2969_s15, [#allocation11], %s2834_s18, %s2834_s18, %s2835_s19  }
  0x56   : > { %s3587_s5 = sld [smem:[#allocation42_spill]] }
  0x5c   : > { %s2435_s20 = scalar_lea.hbm %s3587_s5, 256 }
  0x5d   : > { %p2436_p11 = scmp.ne.s32.totalorder %s3587_s5, %s2435_s20  ;;  %p2442_p0 = scmp.lt.u32.totalorder %s2435_s20, %s3587_s5 }
  0x5f   : > { %p2438_p12 = pnand %p2436_p11, %p2981_p8 }
  0x61   : > { %p2439_p13 = pneg %p2438_p12 }
  0x63   : > { %p2444_p2 = pnand %p2442_p0, %p2439_p13 }
  0x65   : > { %2447 = shalt.err (!%p2444_p2)
}
  0x66   : > { %s2448_s30 = scalar_lea.vmem %s395_s17, 256  ;;  %p2456_p5 = scmp.lt.s32.totalorder %s395_s17, %s395_s17 }
  0x67   : > { %p2449_p4 = scmp.ne.s32.totalorder %s395_s17, %s2448_s30  ;;  %p2457_p10 = scmp.lt.s32.totalorder %s2448_s30, %s2448_s30 }
  0x69   : > { %p2451_p7 = pnand %p2449_p4, %p2981_p8  ;;  %p2458_p1 = por %p2457_p10, %p2456_p5 }
  0x6b   : > { %p2452_p9 = pneg %p2451_p7 }
  0x6d   : > { %p2459_p3 = pnand %p2458_p1, %p2452_p9 }
  0x6f   : > { %2462 = shalt.err (!%p2459_p3)
}
  0x70   : > { %2234 = dma.hbm_to_vmem [thread:$0]  (!%p2965_p6), %s3587_s5, 256, %s395_s17, [#allocation14], %s2834_s18, %s2834_s18, %s2835_s19  }
  0x71   : > { %s2836_s1 = smov [#allocation16]   ;;  %s2837_s28 = smov [#allocation19]  }
  0x72   : > { %s419_s27 = sshll.u32 %s2836_s1, 4  ;;  %s442_s20 = sshll.u32 %s2837_s28, 4  ;;  %s420_s27 = int_to_ptr.vmem [resolvable:$true] %s419_s27  ;;  %s443_s20 = int_to_ptr.vmem [resolvable:$true] %s442_s20 }
  0x73   : > { %s2463_s16 = scalar_lea.hbm %s3554_s7, 16 }
  0x74   : > { %p2464_p1 = scmp.ne.s32.totalorder %s3554_s7, %s2463_s16  ;;  %p2470_p12 = scmp.lt.u32.totalorder %s2463_s16, %s3554_s7 }
  0x76   : > { %p2466_p3 = pnand %p2464_p1, %p2981_p8 }
  0x78   : > { %p2467_p11 = pneg %p2466_p3 }
  0x7a   : > { %p2472_p13 = pnand %p2470_p12, %p2467_p11 }
  0x7c   : > { %2475 = shalt.err (!%p2472_p13)
}
  0x7d   : > { %s2476_s17 = scalar_lea.vmem %s420_s27, 16  ;;  %s2483_s0 = scalar_lea.vmem %s420_s27, 32 }
  0x7e   : > { %p2477_p0 = scmp.ne.s32.totalorder %s420_s27, %s2476_s17  ;;  %p2484_p7 = scmp.lt.s32.totalorder %s420_s27, %s420_s27 }
  0x7f   : > { %p2485_p9 = scmp.lt.s32.totalorder %s2483_s0, %s2476_s17 }
  0x80   : > { %p2479_p2 = pnand %p2477_p0, %p2981_p8 }
  0x81   : > { %p2486_p5 = por %p2485_p9, %p2484_p7 }
  0x82   : > { %p2480_p4 = pneg %p2479_p2 }
  0x84   : > { %p2487_p10 = pnand %p2486_p5, %p2480_p4 }
  0x86   : > { %2490 = shalt.err (!%p2487_p10)
}
  0x87   : > { %2240 = dma.hbm_to_vmem [thread:$0]  (!%p2965_p6), %s3554_s7, 16, %s420_s27, [#allocation17]  }
  0x88   : > { %s2491_s14 = scalar_lea.hbm %s3556_s9, 512 }
  0x89   : > { %p2492_p1 = scmp.ne.s32.totalorder %s3556_s9, %s2491_s14  ;;  %p2498_p12 = scmp.lt.u32.totalorder %s2491_s14, %s3556_s9 }
  0x8b   : > { %p2494_p3 = pnand %p2492_p1, %p2981_p8 }
  0x8d   : > { %p2495_p11 = pneg %p2494_p3 }
  0x8f   : > { %p2500_p13 = pnand %p2498_p12, %p2495_p11 }
  0x91   : > { %2503 = shalt.err (!%p2500_p13)
}
  0x92   : > { %s2504_s17 = scalar_lea.vmem %s443_s20, 512  ;;  %p2512_p7 = scmp.lt.s32.totalorder %s443_s20, %s443_s20 }
  0x93   : > { %p2505_p0 = scmp.ne.s32.totalorder %s443_s20, %s2504_s17  ;;  %p2513_p9 = scmp.lt.s32.totalorder %s2504_s17, %s2504_s17 }
  0x95   : > { %p2507_p2 = pnand %p2505_p0, %p2981_p8  ;;  %p2514_p5 = por %p2513_p9, %p2512_p7 }
  0x97   : > { %p2508_p4 = pneg %p2507_p2 }
  0x99   : > { %p2515_p10 = pnand %p2514_p5, %p2508_p4 }
  0x9b   : > { %2518 = shalt.err (!%p2515_p10)
}
  0x9c   : > { %2246 = dma.hbm_to_vmem [thread:$0]  (!%p2965_p6), %s3556_s9, 512, %s443_s20, [#allocation20], %s2834_s18, %s2834_s18, %s2835_s19  }
  0x9d   : > { %s2838_s1 = smov [#allocation12]   ;;  %s2839_s2 = smov [#allocation15]  }
  0x9e   : > { %s381_s28 = sshll.u32 %s2838_s1, 4  ;;  %s408_s29 = sshll.u32 %s2839_s2, 4  ;;  %s382_s28 = int_to_ptr.vmem [resolvable:$true] %s381_s28  ;;  %s409_s29 = int_to_ptr.vmem [resolvable:$true] %s408_s29 }
  0x9f   : > { %s3588_s4 = sld [smem:[#allocation41_spill]] }
  0xa5   : > { %s2519_s12 = scalar_lea.hbm %s3588_s4, 256 }
  0xa6   : > { %p2520_p1 = scmp.ne.s32.totalorder %s3588_s4, %s2519_s12  ;;  %p2526_p12 = scmp.lt.u32.totalorder %s2519_s12, %s3588_s4 }
  0xa8   : > { %p2522_p3 = pnand %p2520_p1, %p2981_p8 }
  0xaa   : > { %p2523_p11 = pneg %p2522_p3 }
  0xac   : > { %p2528_p13 = pnand %p2526_p12, %p2523_p11 }
  0xae   : > { %2531 = shalt.err (!%p2528_p13)
}
  0xaf   : > { %s2532_s20 = scalar_lea.vmem %s382_s28, 256  ;;  %p2540_p7 = scmp.lt.s32.totalorder %s382_s28, %s382_s28 }
  0xb0   : > { %p2533_p0 = scmp.ne.s32.totalorder %s382_s28, %s2532_s20  ;;  %p2541_p9 = scmp.lt.s32.totalorder %s2532_s20, %s2532_s20 }
  0xb2   : > { %p2535_p2 = pnand %p2533_p0, %p2981_p8  ;;  %p2542_p5 = por %p2541_p9, %p2540_p7 }
  0xb4   : > { %p2536_p4 = pneg %p2535_p2 }
  0xb6   : > { %p2543_p10 = pnand %p2542_p5, %p2536_p4 }
  0xb8   : > { %2546 = shalt.err (!%p2543_p10)
}
  0xb9   : > { %2231 = dma.hbm_to_vmem [thread:$0]  (!%p2965_p6), %s3588_s4, 256, %s382_s28, [#allocation11], %s2834_s18, %s2834_s18, %s2835_s19  }
  0xba   : > { %s3589_s6 = sld [smem:[#allocation43_spill]] }
  0xc0   : > { %s2547_s16 = scalar_lea.hbm %s3589_s6, 16 }
  0xc1   : > { %p2548_p1 = scmp.ne.s32.totalorder %s3589_s6, %s2547_s16  ;;  %p2554_p12 = scmp.lt.u32.totalorder %s2547_s16, %s3589_s6 }
  0xc3   : > { %p2550_p3 = pnand %p2548_p1, %p2981_p8 }
  0xc5   : > { %p2551_p11 = pneg %p2550_p3 }
  0xc7   : > { %p2556_p13 = pnand %p2554_p12, %p2551_p11 }
  0xc9   : > { %2559 = shalt.err (!%p2556_p13)
}
  0xca   : > { %s2560_s27 = scalar_lea.vmem %s409_s29, 16  ;;  %s2567_s28 = scalar_lea.vmem %s409_s29, 32 }
  0xcb   : > { %p2561_p0 = scmp.ne.s32.totalorder %s409_s29, %s2560_s27  ;;  %p2568_p7 = scmp.lt.s32.totalorder %s409_s29, %s409_s29 }
  0xcc   : > { %p2569_p9 = scmp.lt.s32.totalorder %s2567_s28, %s2560_s27 }
  0xcd   : > { %p2563_p2 = pnand %p2561_p0, %p2981_p8 }
  0xce   : > { %p2570_p5 = por %p2569_p9, %p2568_p7 }
  0xcf   : > { %p2564_p4 = pneg %p2563_p2 }
  0xd1   : > { %p2571_p10 = pnand %p2570_p5, %p2564_p4 }
  0xd3   : > { %2574 = shalt.err (!%p2571_p10)
}
  0xd4   : > { %2237 = dma.hbm_to_vmem [thread:$0]  (!%p2965_p6), %s3589_s6, 16, %s409_s29, [#allocation14]  }
  0xd5   : > { %s2840_s1 = smov [#allocation18]   ;;  %s2841_s14 = smov [#allocation21]  }
  0xd6   : > { %s429_s2 = sshll.u32 %s2840_s1, 4  ;;  %s456_s16 = sshll.u32 %s2841_s14, 4  ;;  %s430_s2 = int_to_ptr.vmem [resolvable:$true] %s429_s2  ;;  %s457_s16 = int_to_ptr.vmem [resolvable:$true] %s456_s16 }
  0xd7   : > { %s2575_s15 = scalar_lea.hbm %s3555_s8, 256 }
  0xd8   : > { %p2576_p1 = scmp.ne.s32.totalorder %s3555_s8, %s2575_s15  ;;  %p2582_p12 = scmp.lt.u32.totalorder %s2575_s15, %s3555_s8 }
  0xda   : > { %p2578_p3 = pnand %p2576_p1, %p2981_p8 }
  0xdc   : > { %p2579_p11 = pneg %p2578_p3 }
  0xde   : > { %p2584_p13 = pnand %p2582_p12, %p2579_p11 }
  0xe0   : > { %2587 = shalt.err (!%p2584_p13)
}
  0xe1   : > { %s2588_s29 = scalar_lea.vmem %s430_s2, 256  ;;  %p2596_p7 = scmp.lt.s32.totalorder %s430_s2, %s430_s2 }
  0xe2   : > { %p2589_p0 = scmp.ne.s32.totalorder %s430_s2, %s2588_s29  ;;  %p2597_p9 = scmp.lt.s32.totalorder %s2588_s29, %s2588_s29 }
  0xe4   : > { %p2591_p2 = pnand %p2589_p0, %p2981_p8  ;;  %p2598_p5 = por %p2597_p9, %p2596_p7 }
  0xe6   : > { %p2592_p4 = pneg %p2591_p2 }
  0xe8   : > { %p2599_p10 = pnand %p2598_p5, %p2592_p4 }
  0xea   : > { %2602 = shalt.err (!%p2599_p10)
}
  0xeb   : > { %2243 = dma.hbm_to_vmem [thread:$0]  (!%p2965_p6), %s3555_s8, 256, %s430_s2, [#allocation17], %s2834_s18, %s2834_s18, %s2835_s19  }
  0xec   : > { %s2603_s30 = scalar_lea.hbm %s3557_s10, 16 }
  0xed   : > { %p2604_p1 = scmp.ne.s32.totalorder %s3557_s10, %s2603_s30  ;;  %p2610_p12 = scmp.lt.u32.totalorder %s2603_s30, %s3557_s10 }
  0xef   : > { %p2606_p3 = pnand %p2604_p1, %p2981_p8 }
  0xf1   : > { %p2607_p11 = pneg %p2606_p3 }
  0xf3   : > { %p2612_p13 = pnand %p2610_p12, %p2607_p11 }
  0xf5   : > { %2615 = shalt.err (!%p2612_p13)
}
  0xf6   : > { %s2616_s20 = scalar_lea.vmem %s457_s16, 16  ;;  %s2623_s18 = scalar_lea.vmem %s457_s16, 32 }
  0xf7   : > { %p2617_p0 = scmp.ne.s32.totalorder %s457_s16, %s2616_s20  ;;  %p2624_p7 = scmp.lt.s32.totalorder %s457_s16, %s457_s16 }
  0xf8   : > { %p2625_p9 = scmp.lt.s32.totalorder %s2623_s18, %s2616_s20 }
  0xf9   : > { %p2619_p2 = pnand %p2617_p0, %p2981_p8 }
  0xfa   : > { %p2626_p5 = por %p2625_p9, %p2624_p7 }
  0xfb   : > { %p2620_p4 = pneg %p2619_p2 }
  0xfd   : > { %p2627_p10 = pnand %p2626_p5, %p2620_p4 }
  0xff   : > { %2630 = shalt.err (!%p2627_p10)
}
 0x100   : > { %2249 = dma.hbm_to_vmem [thread:$0]  (!%p2965_p6), %s3557_s10, 16, %s457_s16, [#allocation20]  }
 0x101   : > { %s2842_s29 = smov [#allocation22]   ;;  %s2631_s12 = scalar_lea.hbm %s3558_s11, 16 }
 0x102   : > { %s467_s0 = sshll.u32 %s2842_s29, 4  ;;  %p2632_p1 = scmp.ne.s32.totalorder %s3558_s11, %s2631_s12  ;;  %s468_s0 = int_to_ptr.vmem [resolvable:$true] %s467_s0 }
 0x103   : > { %p2638_p12 = scmp.lt.u32.totalorder %s2631_s12, %s3558_s11 }
 0x104   : > { %p2634_p3 = pnand %p2632_p1, %p2981_p8 }
 0x106   : > { %p2635_p11 = pneg %p2634_p3 }
 0x108   : > { %p2640_p13 = pnand %p2638_p12, %p2635_p11 }
 0x10a   : > { %2643 = shalt.err (!%p2640_p13)
}
 0x10b   : > { %s2644_s16 = scalar_lea.vmem %s468_s0, 16  ;;  %s2651_s28 = scalar_lea.vmem %s468_s0, 32 }
 0x10c   : > { %p2645_p0 = scmp.ne.s32.totalorder %s468_s0, %s2644_s16  ;;  %p2652_p7 = scmp.lt.s32.totalorder %s468_s0, %s468_s0 }
 0x10d   : > { %p2653_p9 = scmp.lt.s32.totalorder %s2651_s28, %s2644_s16 }
 0x10e   : > { %p2647_p2 = pnand %p2645_p0, %p2981_p8 }
 0x10f   : > { %p2654_p5 = por %p2653_p9, %p2652_p7 }
 0x110   : > { %p2648_p4 = pneg %p2647_p2 }
 0x112   : > { %p2655_p10 = pnand %p2654_p5, %p2648_p4 }
 0x114   : > { %2658 = shalt.err (!%p2655_p10)
}
 0x115   : > { %s3590_s24 = sld [smem:[#allocation35_spill]]  ;;  %s2003_s19 = sadd.s32 4294967294, %s2829_s26  }
 0x116   : > { %2252 = dma.hbm_to_vmem [thread:$0]  (!%p2965_p6), %s3558_s11, 16, %s468_s0, [#allocation23]  }
 0x117   : > { %s48_s2 = sadd.s32 1, %s2825_s25  ;;  %s55_s13 = sadd.s32 1, %s2817_s23 }
 0x118   : > { %p50_p8 = scmp.ge.s32.totalorder %s48_s2, 2  ;;  %p62_p1 = scmp.ne.s32.totalorder %s2817_s23, %s2813_s22 }
 0x119   : > { %p63_p3 = scmp.eq.s32.totalorder %s2829_s26, 0  ;;  %p68_p12 = scmp.ne.s32.totalorder %s2813_s22, %s2809_s21 }
 0x11a   : > { %s3627_s2 = smov (%p50_p8, %s48_s2), 0  ;;  %p336_p7 = scmp.eq.s32.totalorder %s2003_s19, 1 }
 0x11b   : > { %p3196_p11 = por %p63_p3, %p62_p1  ;;  %s52_s0 = ssub.s32 %s2825_s25, %s3627_s2 }
 0x11c   : > { %p330_p6 = scmp.eq.s32.totalorder %s3590_s24, 1  ;;  %p53_p13 = scmp.eq.s32.totalorder %s52_s0, 0 }
 0x11d   : > { %p3592_p0 = scmp.eq.s32.totalorder %s3590_s24, 0  ;;  %p3218_p9 = por %p336_p7, %p68_p12 }
 0x11e   : > { %p3211_p4 = por %p330_p6, %p62_p1  ;;  %p2274_p5 = scmp.lt.s32.totalorder %s2829_s26, 2 }
 0x11f   : > { %p3207_p2 = por %p3592_p0, %p68_p12  ;;  %s3224_s15 = sand.u32 1, %s2817_s23  }
 0x120   : > { %s3594_s14 = scalar_select %p3211_p4, 1, 0 }
 0x121   : > { %s3593_s1 = scalar_select %p3207_p2, 1, 0 }
 0x122   : > { %s3216_s12 = scalar_select %p53_p13, %s2817_s23, %s55_s13  }
 0x123   : > { %s3595_s30 = scalar_select %p3218_p9, 1, 0 }
 0x124   : > { %s2017_s17 = sshll.u32 %s2825_s25, 6  ;;  %s2016_s27 = sshll.u32 %s3224_s15, 2 }
 0x125   : > { %s3596_s20 = sld [smem:[#allocation37_spill]]  ;;  %s482_s24 = scalar_lea.vmem [#allocation4], %s2016_s27 }
 0x126   : > { %s489_s19 = sshll.u32 %s482_s24, 4  ;;  %p3235_p10 = pnand %p2274_p5, %p3196_p11  ;;  %s3239_s19 = int_to_ptr.vmem [resolvable:$true] %s489_s19 }
 0x127   : > { %s479_s3 = scalar_lea.sflag [#allocation5], %s3224_s15 }
 0x128   : > { %p2661_p1 = pneg %p3235_p10 }
 0x12b   : > { %s3231_s18 = scalar_lea.hbm %s3596_s20, %s2017_s17  ;;  %s2664_s27 = scalar_lea.hbm %s3596_s20, 128 }
 0x12c   : > { %s2659_s16 = scalar_lea.hbm %s3231_s18, 64  ;;  %p2665_p11 = scmp.lt.u32.totalorder %s3231_s18, %s3596_s20 }
 0x12d   : > { %p2660_p8 = scmp.ne.s32.totalorder %s3231_s18, %s2659_s16  ;;  %p2666_p6 = scmp.lt.u32.totalorder %s2664_s27, %s2659_s16 }
 0x12e   : > { %p2668_p0 = scmp.lt.u32.totalorder %s2659_s16, %s3231_s18 }
 0x12f   : > { %p2662_p3 = pnand %p2661_p1, %p2660_p8  ;;  %p2667_p13 = por %p2666_p6, %p2665_p11 }
 0x131   : > { %p2663_p12 = pneg %p2662_p3  ;;  %p2669_p7 = por %p2668_p0, %p2667_p13 }
 0x133   : > { %p2670_p5 = pnand %p2669_p7, %p2663_p12 }
 0x135   : > { %2673 = shalt.err (!%p2670_p5)
}
 0x136   : > { %s2674_s0 = scalar_lea.vmem %s3239_s19, 64  ;;  %s2843_s17 = smov [#allocation4]  }
 0x137   : > { %p2675_p8 = scmp.ne.s32.totalorder %s3239_s19, %s2674_s0  ;;  %s2679_s29 = sshll.u32 %s2843_s17, 4  ;;  %s2680_s29 = int_to_ptr.vmem [resolvable:$false] %s2679_s29 }
 0x138   : > { %s2681_s28 = scalar_lea.vmem %s2680_s29, 128  ;;  %p2682_p4 = scmp.lt.s32.totalorder %s3239_s19, %s2680_s29 }
 0x139   : > { %p2677_p3 = pnand %p2675_p8, %p2661_p1  ;;  %p2683_p11 = scmp.lt.s32.totalorder %s2681_s28, %s2674_s0 }
 0x13b   : > { %p2678_p9 = pneg %p2677_p3  ;;  %p2684_p6 = por %p2683_p11, %p2682_p4 }
 0x13d   : > { %p2685_p13 = pnand %p2684_p6, %p2678_p9 }
 0x13f   : > { %2688 = shalt.err (!%p2685_p13)
}
 0x140   : > { %2256 = dma.hbm_to_vmem [thread:$0]  (!%p3235_p10), %s3231_s18, 64, %s3239_s19, %s479_s3  }
 0x141   : > { %s2018_s16 = sshll.u32 %s2825_s25, 4  ;;  %s3598_s17 = sld [smem:[#allocation38_spill]] }
 0x142   : > { %s499_s0 = scalar_lea.vmem [#allocation7], %s3224_s15  ;;  %s3599_s28 = sand.u32 1, %s2829_s26  }
 0x143   : > { %s506_s29 = sshll.u32 %s499_s0, 4  ;;  %s497_s5 = scalar_lea.sflag [#allocation8], %s3599_s28  ;;  %s507_s29 = int_to_ptr.vmem [resolvable:$true] %s506_s29 }
 0x147   : > { %s3272_s4 = scalar_lea.hbm %s3598_s17, %s2018_s16  ;;  %s2694_s19 = scalar_lea.hbm %s3598_s17, 32 }
 0x148   : > { %s2689_s6 = scalar_lea.hbm %s3272_s4, 16  ;;  %p2695_p0 = scmp.lt.u32.totalorder %s3272_s4, %s3598_s17 }
 0x149   : > { %p2690_p4 = scmp.ne.s32.totalorder %s3272_s4, %s2689_s6  ;;  %p2696_p7 = scmp.lt.u32.totalorder %s2694_s19, %s2689_s6 }
 0x14a   : > { %p2698_p8 = scmp.lt.u32.totalorder %s2689_s6, %s3272_s4 }
 0x14b   : > { %p2692_p9 = pnand %p2690_p4, %p2661_p1  ;;  %p2697_p5 = por %p2696_p7, %p2695_p0 }
 0x14d   : > { %p2693_p12 = pneg %p2692_p9  ;;  %p2699_p3 = por %p2698_p8, %p2697_p5 }
 0x14f   : > { %p2700_p11 = pnand %p2699_p3, %p2693_p12 }
 0x151   : > { %2703 = shalt.err (!%p2700_p11)
}
 0x152   : > { %s2704_s15 = scalar_lea.vmem %s507_s29, 16  ;;  %s2844_s24 = smov [#allocation7]  }
 0x153   : > { %p2705_p6 = scmp.ne.s32.totalorder %s507_s29, %s2704_s15  ;;  %s2709_s0 = sshll.u32 %s2844_s24, 4  ;;  %s2710_s0 = int_to_ptr.vmem [resolvable:$false] %s2709_s0 }
 0x154   : > { %s2711_s28 = scalar_lea.vmem %s2710_s0, 32  ;;  %p2712_p9 = scmp.lt.s32.totalorder %s507_s29, %s2710_s0 }
 0x155   : > { %p2707_p13 = pnand %p2705_p6, %p2661_p1  ;;  %p2713_p2 = scmp.lt.s32.totalorder %s2711_s28, %s2704_s15 }
 0x157   : > { %p2708_p4 = pneg %p2707_p13  ;;  %p2714_p0 = por %p2713_p2, %p2712_p9 }
 0x159   : > { %p2715_p7 = pnand %p2714_p0, %p2708_p4 }
 0x15b   : > { %2718 = shalt.err (!%p2715_p7)
}
 0x15c   : > { %2259 = dma.hbm_to_vmem [thread:$0]  (!%p3235_p10), %s3272_s4, 16, %s507_s29, %s497_s5  }
 0x15d   : > { %s3600_s6 = sld [smem:[#allocation36_spill]] }
 0x163   : > { %p3601_p12 = scmp.ne.s32.totalorder %s3600_s6, 0 }
 0x164   : > { %s3299_s3 = sand.u32 (!%p3601_p12), 1, %s2813_s22   ;;  %p3602_p2 = scmp.ne.s32.totalorder (!%p3601_p12), %s3593_s1, 0 }
 0x165   : > { %515 = sbr.rel (%p3601_p12) target bundleno = 2496 (0x9c0), region = 68  ;;  %s2020_s18 = sshll.u32 (!%p3601_p12), %s3299_s3, 2 }
 0x166   : > { %s518_s19 = scalar_lea.sflag (!%p3601_p12), [#allocation5], %s3299_s3  ;;  %s3305_s16 = scalar_lea.vmem (!%p3601_p12), [#allocation4], %s2020_s18 }
 0x16c   : > { %2772 = dma.done.wait (%p3602_p2), %s518_s19, 64  }
 0x16d   : > { %2774 = vsyncadd (%p3602_p2), %s518_s19, 4294967232  ;;  %s3603_s4 = sld [smem:[#allocation35_spill]]  ;;  %s529_s29 = scalar_lea.vmem [#allocation7], %s3299_s3 }
 0x173   : > { %s526_s5 = sand.u32 1, %s3603_s4  }
 0x174   : > { %s527_s13 = scalar_lea.sflag [#allocation8], %s526_s5 }
 0x175   : > { %2776 = dma.done.wait (%p3602_p2), %s527_s13, 16  }
 0x176   : > { %2778 = vsyncadd (%p3602_p2), %s527_s13, 4294967280  ;;  %p3604_p10 = scmp.eq.s32.totalorder %s3603_s4, 0 }
 0x178   : > { %2780 = dma.done.wait (%p3604_p10), [#allocation8], 256   ;;  %p3605_p1 = pmov %p3604_p10 }
 0x17a   : > { %2782 = vsyncadd (%p3605_p1), [#allocation8], 4294967040  ;;  %p3606_p5 = pmov %p3605_p1 }
 0x17b   : > { %p3607_p8 = pmov %p3605_p1 }
 0x17c   : > { %2784 = dma.done.wait (%p3606_p5), [#allocation11], 512  }
 0x17d   : > { %2786 = vsyncadd (%p3607_p8), [#allocation11], 4294966784  ;;  %p3608_p3 = pmov %p3605_p1 }
 0x17e   : > { %p3609_p11 = pmov %p3605_p1 }
 0x17f   : > { %2788 = dma.done.wait (%p3608_p3), [#allocation14], 272  }
 0x180   : > { %2790 = vsyncadd (%p3609_p11), [#allocation14], 4294967024  ;;  %p3610_p6 = pmov %p3605_p1 }
 0x181   : > { %p3611_p13 = pmov %p3605_p1 }
 0x182   : > { %2792 = dma.done.wait (%p3610_p6), [#allocation17], 272  }
 0x183   : > { %2794 = vsyncadd (%p3611_p13), [#allocation17], 4294967024  ;;  %p3612_p4 = pmov %p3605_p1 }
 0x184   : > { %p3613_p9 = pmov %p3605_p1 }
 0x185   : > { %2796 = dma.done.wait (%p3612_p4), [#allocation20], 528  }
 0x186   : > { %2798 = vsyncadd (%p3613_p9), [#allocation20], 4294966768  ;;  %p3614_p0 = pmov %p3605_p1 }
 0x188   : > { %2800 = dma.done.wait (%p3614_p0), [#allocation23], 16   ;;  %p3615_p7 = pmov %p3614_p0 }
 0x189   : > { %v2845_v0 = vmov 0.0   ;;  %vm2846_vm0 = vmmov 0   ;;  %v2353_v1 = vld [vmem:[#allocation10] sm:$0xff]   ;;  %v2354_v2 = vld [vmem:[#allocation10 + $0x8] sm:$0xff]   ;;  %v2355_v4 = vld [vmem:[#allocation9] sm:$0xff]   ;;  %vm636_vm1 = vcmask 261120   ;;  %v744_v24 = vlaneseq }
 0x18a   : > { %2802 = vsyncadd (%p3615_p7), [#allocation23], 4294967280  ;;  %2100 = vmatprep.subr.bf16.mxu0 %v2845_v0  ;;  %2104 = vmatprep.mubr.msk.bf16.mxu0 %vm2846_vm0, %v2845_v0  ;;  %v619_v3 = vld [vmem:[%s3305_s16] sm:$0xf]  ;;  %v2357_v5 = vld [vmem:[#allocation12] sm:$0xff]   ;;  %s2847_s1 = smov 112  }
 0x18b   : > { %2108 = vmatprep.subr.bf16.mxu1 %v2845_v0  ;;  %2112 = vmatprep.mubr.msk.bf16.mxu1 %vm2846_vm0, %v2845_v0  ;;  %v2358_v6 = vld [vmem:[#allocation12 + $0x8] sm:$0xff]   ;;  %v3357_v8 = vld [vmem:[%s3305_s16] sm:$0xf]  ;;  %v2848_v22 = vmov 1983009808   ;;  %v3371_v26 = vshrl.u32 %v744_v24, 7 }
 0x18c   : > { %2101 = vmatpush3.bf16.msra.mxu0 %v2353_v1  ;;  %2109 = vmatpush3.bf16.msra.mxu1 %v2357_v5  ;;  %v2356_v7 = vld [vmem:[#allocation9 + $0x8] sm:$0xff]   ;;  %v742_v23 = vunpack.c.l.s4 %v2848_v22  ;;  %v2849_v27 = vmov 1934713408   ;;  %vm858_vm2 = vcmask 125952   ;;  %vm1189_vm3 = vcmask 130048   ;;  %s2851_s27 = smov 16  }
 0x18d   : > { %2102 = vmatprep.subr.bf16.mxu0 %v2845_v0  ;;  %2110 = vmatprep.subr.bf16.mxu1 %v2845_v0  ;;  %v773_v28 = vunpack.c.l.s4 %v2849_v27  ;;  %vm1314_vm4 = vcmask 1043456   ;;  %vm1286_vm9 = vcmask 64512   ;;  %vm1714_vm10 = vcmask 523264   ;;  %s3616_s15 = sld [smem:[#allocation34_spill]]  ;;  %s613_s0 = scalar_lea.vmem [#allocation24], %s2020_s18 }
 0x18e   : > { %v743_v25 = vunpack.c.0.s8 %v742_v23  ;;  %s1808_s28 = sshll.u32 %s613_s0, 4  ;;  %vm1791_vm11 = vcmask 257024   ;;  %s3617_s16 = sld [smem:[#allocation44_spill]]  ;;  %s3500_s28 = int_to_ptr.vmem [resolvable:$true] %s1808_s28 }
 0x18f   : > { %v774_v30 = vunpack.c.0.s8 %v773_v28  ;;  %s1794_s5 = scalar_lea.sflag [#allocation6], %s3299_s3  ;;  %s2719_s13 = scalar_lea.vmem %s3500_s28, 64 }
 0x190   : > { %2103 = vmatpush3.bf16.msra.mxu0 %v2354_v2  ;;  %2111 = vmatpush3.bf16.msra.mxu1 %v2358_v6  ;;  %v3374_v29 = vsub.s32 %v743_v25, %v3371_v26  ;;  %p2720_p12 = scmp.ne.s32.totalorder %s3500_s28, %s2719_s13  ;;  %p3618_p2 = scmp.ne.s32.totalorder %s3594_s14, 0 }
 0x191   : > { %2116 = vmatprep.subr.bf16.mxu0 %v2845_v0  ;;  %2124 = vmatprep.subr.bf16.mxu1 %v2845_v0  ;;  %v3379_v34 = vsub.s32 %v774_v30, %v3371_v26  ;;  %s2852_s18 = smov [#allocation24]  }
 0x192   : > { %p2721_p10 = pnand %p2720_p12, %p3618_p2 }
 0x193   : > { %2105 = vmatmul.mubr.msk.bf16.vlgmr.msra.gmra.mrb[0].mxu0 %vm636_vm1, %v619_v3  ;;  %2113 = vmatmul.mubr.msk.bf16.vlgmr.msra.gmra.mrb[0].mxu1 %vm636_vm1, %v619_v3  ;;  %s2069_s24 = sshll.u32 %s3616_s15, 6 }
 0x194   : > { %2117 = vmatpush3.bf16.msra.mxu0 %v2355_v4  ;;  %2120 = vmatprep.mubr.msk.bf16.mxu0 %vm2846_vm0, %v2845_v0  ;;  %s3498_s4 = scalar_lea.hbm %s3617_s16, %s2069_s24  ;;  %p2722_p1 = pneg %p2721_p10 }
 0x195   : > { %2118 = vmatprep.subr.bf16.mxu0 %v2845_v0  ;;  %2126 = vmatprep.mubr.msk.bf16.mxu1 %vm2846_vm0, %v2845_v0 }
 0x198   : > { %2119 = vmatpush3.bf16.msra.mxu0 %v2356_v7 }
 0x199   : > { %2130 = vmatprep.subr.bf16.mxu0 %v2845_v0 }
 0x19b   : > { %2121 = vmatmul.mubr.msk.bf16.vlgmr.msra.gmra.mrb[4].mxu0 %vm636_vm1, %v3357_v8 }
 0x19c   : > { %2132 = vmatprep.mubr.msk.bf16.mxu0 %vm2846_vm0, %v2845_v0 }
 0x266   : > { %v674_v9 = vpop.f32.mrb[0].mxu0  ;;  %v3367_v18 = vpop.f32.mrb[0].mxu1 }
 0x267   : > { %737 = vrot.lane.b32.xlu0 %v674_v9, %s2847_s1  ;;  %v2106_v10 = vpop.f32.mrb[1].mxu0  ;;  %862 = vrot.lane.b32.xlu1 %v3367_v18, %s2847_s1  ;;  %v2114_v19 = vpop.f32.mrb[1].mxu1  ;;  %v740_v31 = vcombine.high %v674_v9, %v2845_v0  ;;  %v747_v33 = vrot.slane %v674_v9, %v3374_v29  ;;  %v865_v27 = vcombine.high %v3367_v18, %v2845_v0 }
 0x268   : > { %v677_v11 = vpop.f32.mrb[2].mxu0  ;;  %v733_v20 = vpop.f32.mrb[2].mxu1  ;;  %v872_v30 = vrot.slane %v3367_v18, %v3374_v29 }
 0x269   : > { %v2107_v12 = vpop.f32.mrb[3].mxu0  ;;  %v2115_v21 = vpop.f32.mrb[3].mxu1  ;;  %v754_v37 = vrot.slane %v740_v31, %v3374_v29 }
 0x26e   : > { %v1041_v13 = vpop.f32.mrb[4].mxu0 }
 0x26f   : > { %v1047_v14 = vmul.f32 0.25, %v1041_v13  ;;  %v2122_v15 = vpop.f32.mrb[5].mxu0 }
 0x270   : > { %v1044_v16 = vpop.f32.mrb[6].mxu0 }
 0x271   : > { %1049 = vrot.lane.b32.xlu0 %v1047_v14, %s2847_s1  ;;  %v2123_v17 = vpop.f32.mrb[7].mxu0  ;;  %v1052_v49 = vcombine.high %v1047_v14, %v2845_v0  ;;  %v1059_v59 = vrot.slane %v1047_v14, %v3374_v29 }
 0x273   : > { %v1066_v61 = vrot.slane %v1052_v49, %v3374_v29 }
 0x2d9   : > { %v738_v32 = vpop.permute.xlu0 %737  ;;  %v863_v31 = vpop.permute.xlu1 %862 }
 0x2da   : > { %v755_v35 = vcombine.high %v738_v32, %v2845_v0  ;;  %v762_v36 = vrot.slane %v738_v32, %v3374_v29 }
 0x2dc   : > { %v769_v38 = vrot.slane %v755_v35, %v3374_v29  ;;  %v770_v39 = vcombine.low %v747_v33, %v762_v36  ;;  %v771_v40 = vcombine.high %v747_v33, %v762_v36  ;;  %v880_v33 = vcombine.high %v863_v31, %v2845_v0 }
 0x2dd   : > { %v887_v35 = vrot.slane %v863_v31, %v3374_v29  ;;  %v879_v36 = vrot.slane %v865_v27, %v3374_v29 }
 0x2de   : > { %v778_v41 = vrot.slane %v770_v39, %v3379_v34  ;;  %v785_v42 = vrot.slane %v771_v40, %v3379_v34  ;;  %v786_v43 = vcombine.low %v754_v37, %v769_v38  ;;  %v787_v44 = vcombine.high %v754_v37, %v769_v38 }
 0x2df   : > { %v894_v38 = vrot.slane %v880_v33, %v3374_v29  ;;  %v895_v39 = vcombine.low %v872_v30, %v887_v35 }
 0x2e0   : > { %v794_v45 = vrot.slane %v786_v43, %v3379_v34  ;;  %v801_v46 = vrot.slane %v787_v44, %v3379_v34  ;;  %v806_v47 = vcombine.low %v778_v41, %v785_v42  ;;  %v2038_v48 = vcombine.high %v778_v41, %v785_v42 }
 0x2e1   : > { %v896_v42 = vcombine.high %v872_v30, %v887_v35 }
 0x2e2   : > { %v813_v50 = vrot.slane %v806_v47, %v3374_v29  ;;  %v821_v51 = vrot.slane %v2038_v48, %v3374_v29  ;;  %v822_v52 = vcombine.low %v794_v45, %v801_v46  ;;  %v2039_v53 = vcombine.high %v794_v45, %v801_v46 }
 0x2e3   : > { %v1050_v54 = vpop.permute.xlu0 %1049  ;;  %v903_v45 = vrot.slane %v895_v39, %v3379_v34  ;;  %v910_v46 = vrot.slane %v896_v42, %v3379_v34  ;;  %v911_v47 = vcombine.low %v879_v36, %v894_v38 }
 0x2e4   : > { %v829_v55 = vrot.slane %v822_v52, %v3374_v29  ;;  %v837_v56 = vrot.slane %v2039_v53, %v3374_v29  ;;  %v838_v57 = vcombine.low %v813_v50, %v821_v51  ;;  %v1067_v58 = vcombine.high %v1050_v54, %v2845_v0 }
 0x2e5   : > { %v1074_v60 = vrot.slane %v1050_v54, %v3374_v29  ;;  %v912_v50 = vcombine.high %v879_v36, %v894_v38  ;;  %v919_v51 = vrot.slane %v911_v47, %v3379_v34  ;;  %v931_v52 = vcombine.low %v903_v45, %v910_v46 }
 0x2e6   : > { %v846_v62 = vcombine.low %v829_v55, %v837_v56  ;;  %v1081_v63 = vrot.slane %v1067_v58, %v3374_v29  ;;  %v845_v3 = vrot.slane %v838_v57, %v3379_v34  ;;  %v2040_v53 = vcombine.high %v903_v45, %v910_v46  ;;  %v2359_v45 = vld [vmem:[#allocation13] sm:$0xff]  }
 0x2e7   : > { %v1082_v1 = vcombine.low %v1059_v59, %v1074_v60  ;;  %v1083_v2 = vcombine.high %v1059_v59, %v1074_v60  ;;  %v926_v54 = vrot.slane %v912_v50, %v3379_v34  ;;  %v938_v55 = vrot.slane %v931_v52, %v3374_v29 }
 0x2e8   : > { %v853_v4 = vrot.slane %v846_v62, %v3379_v34  ;;  %v1098_v5 = vcombine.low %v1066_v61, %v1081_v63  ;;  %v1099_v6 = vcombine.high %v1066_v61, %v1081_v63  ;;  %v946_v56 = vrot.slane %v2040_v53, %v3374_v29 }
 0x2e9   : > { %v1090_v7 = vrot.slane %v1082_v1, %v3379_v34  ;;  %v1097_v9 = vrot.slane %v1083_v2, %v3379_v34  ;;  %v947_v59 = vcombine.low %v919_v51, %v926_v54  ;;  %v2041_v60 = vcombine.high %v919_v51, %v926_v54 }
 0x2ea   : > { %v854_v10 = vcombine.low %v845_v3, %v853_v4  ;;  %v855_v11 = vcombine.high %v845_v3, %v853_v4  ;;  %v1106_v12 = vrot.slane %v1098_v5, %v3379_v34  ;;  %v1113_v13 = vrot.slane %v1099_v6, %v3379_v34 }
 0x2eb   : > { %v1118_v14 = vcombine.low %v1090_v7, %v1097_v9  ;;  %v2045_v15 = vcombine.high %v1090_v7, %v1097_v9  ;;  %v963_v61 = vcombine.low %v938_v55, %v946_v56  ;;  %v954_v62 = vrot.slane %v947_v59, %v3374_v29 }
 0x2ec   : > { %v856_v16 = vpack.c.bf16 %v854_v10, %v854_v10  ;;  %v857_v17 = vpack.c.bf16 %v855_v11, %v855_v11  ;;  %v1134_v19 = vcombine.low %v1106_v12, %v1113_v13  ;;  %v2046_v20 = vcombine.high %v1106_v12, %v1113_v13  ;;  %v1177_v13 = vld [vmem:[%s529_s29] sm:$0x1]  ;;  %s2723_s29 = sshll.u32 %s2852_s18, 4  ;;  %s2724_s29 = int_to_ptr.vmem [resolvable:$false] %s2723_s29 }
 0x2ed   : > { %v1125_v21 = vrot.slane %v1118_v14, %v3374_v29  ;;  %v1133_v22 = vrot.slane %v2045_v15, %v3374_v29  ;;  %v962_v63 = vrot.slane %v2041_v60, %v3374_v29  ;;  %v970_v1 = vrot.slane %v963_v61, %v3379_v34  ;;  %s2725_s1 = scalar_lea.vmem %s2724_s29, 128  ;;  %p2726_p5 = scmp.lt.s32.totalorder %s3500_s28, %s2724_s29 }
 0x2ee   : > { %859 = vst.msk [vmem:[#allocation2] sm:$0xf] %vm858_vm2, %v856_v16  ;;  %860 = vst.msk [vmem:[#allocation2 + $0x4] sm:$0xf] %vm858_vm2, %v857_v17  ;;  %v1141_v23 = vrot.slane %v1134_v19, %v3374_v29  ;;  %v1149_v25 = vrot.slane %v2046_v20, %v3374_v29  ;;  %vm1179_vm5 = vcmp.gt.f32.partialorder %v1177_v13, 0.5  ;;  %v1183_v14 = vsub.s32 0, %v3371_v26  ;;  %p2727_p8 = scmp.lt.s32.totalorder %s2725_s1, %s2719_s13 }
 0x2ef   : > { %v1150_v32 = vcombine.low %v1125_v21, %v1133_v22  ;;  %v971_v2 = vcombine.low %v954_v62, %v962_v63  ;;  %v2850_v15 = vmov 0   ;;  %v1176_v17 = vand.u32 127, %v744_v24 }
 0x2f0   : > { %v1158_v28 = vcombine.low %v1141_v23, %v1149_v25  ;;  %v1180_v16 = vsel %vm1179_vm5, 1, %v2850_v15  ;;  %p2728_p3 = por %p2727_p8, %p2726_p5 }
 0x2f1   : > { %v1157_v43 = vrot.slane %v1150_v32, %v3379_v34  ;;  %v978_v3 = vrot.slane %v971_v2, %v3379_v34  ;;  %v1184_v19 = vrot.slane %v1180_v16, %v1183_v14  ;;  %vm1178_vm6 = vcmp.gt.s32.totalorder %v1176_v17, %v3371_v26 }
 0x2f2   : > { %v1165_v37 = vrot.slane %v1158_v28, %v3379_v34  ;;  %p2729_p11 = pnand %p2728_p3, %p2722_p1 }
 0x2f3   : > { %v979_v4 = vcombine.low %v970_v1, %v978_v3  ;;  %v980_v5 = vcombine.high %v970_v1, %v978_v3  ;;  %vm1185_vm7 = vcmp.eq.s32.totalorder %v1184_v19, 1 }
 0x2f4   : > { %v1166_v48 = vcombine.low %v1157_v43, %v1165_v37  ;;  %v1167_v49 = vcombine.high %v1157_v43, %v1165_v37  ;;  %vm1186_vm8 = vmor %vm1178_vm6, %vm1185_vm7 }
 0x2f5   : > { %v1187_v40 = vld [vmem:[#allocation2] sm:$0xf]  ;;  %v1188_v41 = vld [vmem:[#allocation2 + $0x4] sm:$0xf]  ;;  %v981_v6 = vpack.c.bf16 %v979_v4, %v979_v4  ;;  %v982_v7 = vpack.c.bf16 %v980_v5, %v980_v5  ;;  %v2360_v5 = vld [vmem:[#allocation13 + $0x8] sm:$0xff]  }
 0x2f6   : > { %v1194_v18 = vsel %vm1189_vm3, %v1187_v40, 0  ;;  %v1240_v44 = vsel %vm1189_vm3, %v1188_v41, 0  ;;  %v1168_v57 = vpack.c.bf16 %v1166_v48, %v1166_v48  ;;  %v1169_v58 = vpack.c.bf16 %v1167_v49, %v1167_v49 }
 0x2f7   : > { %2125 = vmatpush3.bf16.xpose.msra.mxu1 %v1194_v18  ;;  %2131 = vmatpush3.bf16.xpose.msra.mxu0 %v1240_v44  ;;  %983 = vst.msk [vmem:[#allocation3] sm:$0xf] %vm858_vm2, %v981_v6  ;;  %984 = vst.msk [vmem:[#allocation3 + $0x4] sm:$0xf] %vm858_vm2, %v982_v7 }
 0x2f8   : > { %2136 = vmatprep.subr.bf16.mxu1 %v2845_v0  ;;  %2142 = vmatprep.subr.bf16.mxu0 %v2845_v0 }
 0x2fe   : > { %2127 = vmatmul.mubr.msk.bf16.vlgmr.msra.gmra.mrb[4].mxu1 %vm1189_vm3, %v1168_v57  ;;  %2133 = vmatmul.mubr.msk.bf16.vlgmr.msra.gmra.mrb[8].mxu0 %vm1189_vm3, %v1169_v58  ;;  %v1309_v9 = vld [vmem:[#allocation3] sm:$0xf]  ;;  %v1310_v10 = vld [vmem:[#allocation3 + $0x4] sm:$0xf] }
 0x2ff   : > { %2138 = vmatprep.mubr.msk.bf16.mxu1 %vm2846_vm0, %v2845_v0  ;;  %2144 = vmatprep.mubr.msk.bf16.mxu0 %vm2846_vm0, %v2845_v0  ;;  %v1316_v11 = vsel %vm1314_vm4, %v1309_v9, 0  ;;  %v1362_v12 = vsel %vm1314_vm4, %v1310_v10, 0 }
 0x300   : > { %2137 = vmatpush3.bf16.msra.mxu1 %v1316_v11  ;;  %2143 = vmatpush3.bf16.msra.mxu0 %v1362_v12 }
 0x301   : > { %2148 = vmatprep.subr.bf16.mxu1 %v2845_v0  ;;  %2156 = vmatprep.subr.bf16.mxu0 %v2845_v0 }
 0x3d1   : > { %v1230_v20 = vpop.f32.mrb[4].mxu1  ;;  %v1276_v21 = vpop.f32.mrb[8].mxu0 }
 0x3d2   : > { %v1284_v22 = vsel %vm1186_vm8, -1e+09, %v1230_v20  ;;  %v1285_v23 = vsel %vm1186_vm8, -1e+09, %v1276_v21  ;;  %v2128_v25 = vpop.f32.mrb[5].mxu1  ;;  %v2134_v27 = vpop.f32.mrb[9].mxu0 }
 0x3d3   : > { %v1233_v28 = vpop.f32.mrb[6].mxu1  ;;  %v1279_v30 = vpop.f32.mrb[10].mxu0  ;;  %v1287_v31 = vsel %vm1286_vm9, %v1284_v22, -inf  ;;  %v1290_v32 = vsel %vm1286_vm9, %v1285_v23, -inf }
 0x3d4   : > { %1288 = vmax.xlane.f32.xlu1 %v1287_v31  ;;  %v2129_v24 = vpop.f32.mrb[7].mxu1  ;;  %1291 = vmax.xlane.f32.xlu0 %v1290_v32  ;;  %v2135_v33 = vpop.f32.mrb[11].mxu0 }
 0x461   : > { %v1289_v26 = vpop.xlane.xlu1 %1288  ;;  %v1292_v35 = vpop.xlane.xlu0 %1291 }
 0x462   : > { %v1293_v36 = vsub.f32 %v1284_v22, %v1289_v26  ;;  %v1294_v37 = vsub.f32 %v1285_v23, %v1292_v35 }
 0x464   : > { %v1295_v38 = vmul.f32 1.442695, %v1293_v36  ;;  %v1297_v39 = vmul.f32 1.442695, %v1294_v37 }
 0x466   : > { %2367 = vpow2.f32 %v1295_v38 }
 0x467   : > { %2369 = vpow2.f32 %v1297_v39 }
 0x470   : > { %v2368_v40 = vpop.eup %2367 }
 0x471   : > { %v2370_v41 = vpop.eup %2369  ;;  %v1299_v42 = vsel %vm1286_vm9, %v2368_v40, 0.0  ;;  %v1307_v43 = vpack.c.bf16 %v2368_v40, %v2368_v40  ;;  %v2361_v40 = vld [vmem:[#allocation18] sm:$0xff]  }
 0x472   : > { %1300 = vadd.xlane.f32.xlu0 %v1299_v42  ;;  %v1302_v18 = vsel %vm1286_vm9, %v2370_v41, 0.0  ;;  %v1308_v44 = vpack.c.bf16 %v2370_v41, %v2370_v41  ;;  %v2362_v41 = vld [vmem:[#allocation18 + $0x8] sm:$0xff]   ;;  %v2363_v42 = vld [vmem:[#allocation19] sm:$0xff]  }
 0x473   : > { %1303 = vadd.xlane.f32.xlu1 %v1302_v18  ;;  %2139 = vmatmul.mubr.msk.bf16.vlgmr.msra.gmra.mrb[8].mxu1 %vm1286_vm9, %v1307_v43  ;;  %v2365_v43 = vld [vmem:[#allocation19 + $0x10] sm:$0xff]  }
 0x474   : > { %2145 = vmatmul.mubr.msk.bf16.vlgmr.msra.gmra.mrb[12].mxu0 %vm1286_vm9, %v1308_v44  ;;  %2152 = vmatprep.mubr.msk.bf16.mxu1 %vm2846_vm0, %v2845_v0 }
 0x475   : > { %2160 = vmatprep.mubr.msk.bf16.mxu0 %vm2846_vm0, %v2845_v0  ;;  %2149 = vmatpush3.bf16.msra.mxu1 %v2359_v45 }
 0x476   : > { %2150 = vmatprep.subr.bf16.mxu1 %v2845_v0  ;;  %2157 = vmatpush3.bf16.msra.mxu0 %v2361_v40 }
 0x477   : > { %2158 = vmatprep.subr.bf16.mxu0 %v2845_v0 }
 0x479   : > { %2151 = vmatpush3.bf16.msra.mxu1 %v2360_v5 }
 0x47a   : > { %2164 = vmatprep.subr.bf16.mxu1 %v2845_v0  ;;  %2159 = vmatpush3.bf16.msra.mxu0 %v2362_v41 }
 0x4ff   : > { %v1301_v46 = vpop.xlane.xlu0 %1300 }
 0x500   : > { %v1304_v47 = vpop.xlane.xlu1 %1303  ;;  %2371 = vrcp.f32 %v1301_v46 }
 0x501   : > { %2373 = vrcp.f32 %v1304_v47 }
 0x50a   : > { %v2372_v48 = vpop.eup %2371 }
 0x50b   : > { %v2374_v50 = vpop.eup %2373 }
 0x546   : > { %v1352_v49 = vpop.f32.mrb[8].mxu1 }
 0x547   : > { %v1404_v51 = vmul.f32 %v2372_v48, %v1352_v49  ;;  %v1398_v52 = vpop.f32.mrb[12].mxu0  ;;  %v2140_v53 = vpop.f32.mrb[9].mxu1 }
 0x548   : > { %v1405_v54 = vmul.f32 %v2374_v50, %v1398_v52  ;;  %v2146_v55 = vpop.f32.mrb[13].mxu0  ;;  %v1355_v56 = vpop.f32.mrb[10].mxu1  ;;  %v2056_v53 = vld [vmem:[#allocation15] ss:$0 sm:$0xff] }
 0x549   : > { %v1406_v57 = vcombine.high %v1404_v51, %v2845_v0  ;;  %v1413_v58 = vrot.slane %v1404_v51, %v3374_v29  ;;  %v1401_v59 = vpop.f32.mrb[14].mxu0  ;;  %v2141_v60 = vpop.f32.mrb[11].mxu1  ;;  %v2057_v55 = vld [vmem:[#allocation16] ss:$0 sm:$0xff] }
 0x54a   : > { %v1421_v61 = vcombine.high %v1405_v54, %v2845_v0  ;;  %v1428_v62 = vrot.slane %v1405_v54, %v3374_v29  ;;  %v2147_v63 = vpop.f32.mrb[15].mxu0 }
 0x54b   : > { %v1420_v1 = vrot.slane %v1406_v57, %v3374_v29 }
 0x54c   : > { %v1435_v2 = vrot.slane %v1421_v61, %v3374_v29  ;;  %v1436_v3 = vcombine.low %v1413_v58, %v1428_v62  ;;  %v1437_v4 = vcombine.high %v1413_v58, %v1428_v62 }
 0x54e   : > { %v1444_v6 = vrot.slane %v1436_v3, %v3379_v34  ;;  %v1451_v7 = vrot.slane %v1437_v4, %v3379_v34  ;;  %v1452_v9 = vcombine.low %v1420_v1, %v1435_v2  ;;  %v1453_v10 = vcombine.high %v1420_v1, %v1435_v2 }
 0x550   : > { %v1460_v11 = vrot.slane %v1452_v9, %v3379_v34  ;;  %v1467_v12 = vrot.slane %v1453_v10, %v3379_v34  ;;  %v1472_v13 = vcombine.low %v1444_v6, %v1451_v7  ;;  %v2051_v14 = vcombine.high %v1444_v6, %v1451_v7 }
 0x552   : > { %v1488_v15 = vcombine.low %v1460_v11, %v1467_v12  ;;  %v2052_v16 = vcombine.high %v1460_v11, %v1467_v12  ;;  %v1479_v17 = vrot.slane %v1472_v13, %v3374_v29  ;;  %v1487_v19 = vrot.slane %v2051_v14, %v3374_v29 }
 0x554   : > { %v1495_v20 = vrot.slane %v1488_v15, %v3374_v29  ;;  %v1503_v21 = vrot.slane %v2052_v16, %v3374_v29  ;;  %v1504_v22 = vcombine.low %v1479_v17, %v1487_v19  ;;  %v986_v29 = vunpack.c.l.bf16 %v3357_v8  ;;  %v2364_v8 = vld [vmem:[#allocation19 + $0x8] sm:$0xff]  }
 0x556   : > { %v1512_v23 = vcombine.low %v1495_v20, %v1503_v21  ;;  %v1511_v25 = vrot.slane %v1504_v22, %v3379_v34  ;;  %v2066_v22 = vld [vmem:[#allocation21] ss:$0 sm:$0xff] }
 0x558   : > { %v1519_v27 = vrot.slane %v1512_v23, %v3379_v34 }
 0x55a   : > { %v1521_v28 = vcombine.high %v1511_v25, %v1519_v27  ;;  %v1520_v30 = vcombine.low %v1511_v25, %v1519_v27  ;;  %v2067_v25 = vld [vmem:[#allocation22] ss:$0 sm:$0xff] }
 0x55c   : > { %1523 = vrot.lane.b32.xlu0 %v1521_v28, %s2851_s27 }
 0x5ce   : > { %v1524_v31 = vpop.permute.xlu0 %1523 }
 0x5cf   : > { %v1526_v32 = vsel %vm1189_vm3, %v1520_v30, %v1524_v31 }
 0x5d0   : > { %v1527_v24 = vpack.c.bf16 %v1526_v32, %v1526_v32 }
 0x5d2   : > { %2153 = vmatmul.mubr.msk.bf16.vlgmr.msra.gmra.mrb[12].mxu1 %vm636_vm1, %v1527_v24 }
 0x5d3   : > { %2172 = vmatprep.mubr.msk.bf16.mxu1 %vm2846_vm0, %v2845_v0  ;;  %2165 = vmatpush3.bf16.msra.mxu1 %v2363_v42 }
 0x5d4   : > { %2166 = vmatprep.subr.bf16.mxu1 %v2845_v0 }
 0x5d7   : > { %2167 = vmatpush3.bf16.msra.mxu1 %v2364_v8 }
 0x5d8   : > { %2168 = vmatprep.subr.bf16.mxu1 %v2845_v0 }
 0x5db   : > { %2169 = vmatpush3.bf16.msra.mxu1 %v2365_v43 }
 0x5dc   : > { %2170 = vmatprep.subr.bf16.mxu1 %v2845_v0  ;;  %v2366_v0 = vld [vmem:[#allocation19 + $0x18] sm:$0xff]  }
 0x5df   : > { %2171 = vmatpush3.bf16.msra.mxu1 %v2366_v0 }
 0x6a5   : > { %v1581_v33 = vpop.f32.mrb[12].mxu1 }
 0x6a6   : > { %v1582_v26 = vadd.f32 %v1581_v33, %v986_v29  ;;  %v2154_v35 = vpop.f32.mrb[13].mxu1 }
 0x6a7   : > { %v1584_v36 = vpop.f32.mrb[14].mxu1 }
 0x6a8   : > { %v2155_v34 = vpop.f32.mrb[15].mxu1  ;;  %v1589_v37 = vsel %vm636_vm1, %v1582_v26, 0.0  ;;  %v1594_v38 = vmul.f32 %v1582_v26, %v1582_v26 }
 0x6a9   : > { %1590 = vadd.xlane.f32.xlu1 %v1589_v37 }
 0x6aa   : > { %v1595_v39 = vsel %vm636_vm1, %v1594_v38, 0.0 }
 0x6ad   : > { %1596 = vadd.xlane.f32.xlu1 %v1595_v39 }
 0x736   : > { %v1591_v18 = vpop.xlane.xlu1 %1590 }
 0x737   : > { %v1593_v44 = vmul.f32 0.03125, %v1591_v18 }
 0x739   : > { %v1599_v46 = vmul.f32 %v1593_v44, %v1593_v44  ;;  %v1602_v51 = vsub.f32 %v1582_v26, %v1593_v44 }
 0x73a   : > { %v1597_v45 = vpop.xlane.xlu1 %1596 }
 0x73b   : > { %v1598_v47 = vmul.f32 0.03125, %v1597_v45 }
 0x73d   : > { %v1600_v48 = vsub.f32 %v1598_v47, %v1599_v46 }
 0x73f   : > { %v1601_v49 = vmax.f32 %v1600_v48, 0.0 }
 0x741   : > { %v1603_v50 = vadd.f32 1e-05, %v1601_v49 }
 0x743   : > { %2375 = vrsqrt.f32 %v1603_v50 }
 0x74d   : > { %v2376_v52 = vpop.eup %2375 }
 0x74e   : > { %v1605_v54 = vmul.f32 %v2376_v52, %v1602_v51 }
 0x750   : > { %v1612_v56 = vmul.f32 %v2056_v53, %v1605_v54 }
 0x752   : > { %v1619_v57 = vadd.f32 %v2057_v55, %v1612_v56 }
 0x754   : > { %v1620_v58 = vpack.c.bf16 %v1619_v57, %v1619_v57 }
 0x756   : > { %2161 = vmatmul.mubr.msk.bf16.vlgmr.msra.gmra.mrb[16].mxu0 %vm636_vm1, %v1620_v58 }
 0x829   : > { %v1674_v59 = vpop.f32.mrb[16].mxu0 }
 0x82a   : > { %v1680_v60 = vmax.f32 %v1674_v59, 0.0  ;;  %v2162_v61 = vpop.f32.mrb[17].mxu0 }
 0x82b   : > { %v1677_v62 = vpop.f32.mrb[18].mxu0 }
 0x82c   : > { %v1681_v63 = vpack.c.bf16 %v1680_v60, %v1680_v60  ;;  %v2163_v1 = vpop.f32.mrb[19].mxu0 }
 0x82e   : > { %2173 = vmatmul.mubr.msk.bf16.vlgmr.msra.gmra.mrb[16].mxu1 %vm1714_vm10, %v1681_v63 }
 0x901   : > { %v1752_v2 = vpop.f32.mrb[16].mxu1 }
 0x902   : > { %v1753_v3 = vadd.f32 %v1752_v2, %v1619_v57  ;;  %v2174_v4 = vpop.f32.mrb[17].mxu1 }
 0x903   : > { %v1755_v5 = vpop.f32.mrb[18].mxu1 }
 0x904   : > { %v2175_v6 = vpop.f32.mrb[19].mxu1  ;;  %v1760_v7 = vsel %vm636_vm1, %v1753_v3, 0.0  ;;  %v1764_v9 = vmul.f32 %v1753_v3, %v1753_v3 }
 0x905   : > { %1761 = vadd.xlane.f32.xlu1 %v1760_v7 }
 0x906   : > { %v1765_v10 = vsel %vm636_vm1, %v1764_v9, 0.0 }
 0x909   : > { %1766 = vadd.xlane.f32.xlu1 %v1765_v10 }
 0x992   : > { %v1762_v11 = vpop.xlane.xlu1 %1761 }
 0x993   : > { %v1763_v12 = vmul.f32 0.03125, %v1762_v11 }
 0x995   : > { %v1769_v14 = vmul.f32 %v1763_v12, %v1763_v12  ;;  %v1772_v20 = vsub.f32 %v1753_v3, %v1763_v12 }
 0x996   : > { %v1767_v13 = vpop.xlane.xlu1 %1766 }
 0x997   : > { %v1768_v15 = vmul.f32 0.03125, %v1767_v13 }
 0x999   : > { %v1770_v16 = vsub.f32 %v1768_v15, %v1769_v14 }
 0x99b   : > { %v1771_v17 = vmax.f32 %v1770_v16, 0.0 }
 0x99d   : > { %v1773_v19 = vadd.f32 1e-05, %v1771_v17 }
 0x99f   : > { %2377 = vrsqrt.f32 %v1773_v19 }
 0x9a9   : > { %v2378_v21 = vpop.eup %2377 }
 0x9aa   : > { %v1775_v23 = vmul.f32 %v2378_v21, %v1772_v20 }
 0x9ac   : > { %v1782_v27 = vmul.f32 %v2066_v22, %v1775_v23 }
 0x9ae   : > { %v1789_v28 = vadd.f32 %v2067_v25, %v1782_v27 }
 0x9b0   : > { %v1790_v30 = vpack.c.bf16 %v1789_v28, %v1789_v28 }
 0x9b2   : > { %1792 = vst.msk [vmem:[%s613_s0] sm:$0xf] %vm1791_vm11, %v1790_v30 }
 0x9b3   : > { %2732 = shalt.err (!%p2729_p11)
}
 0x9b4   : > { %s2733_s3 = scalar_lea.hbm %s3498_s4, 64  ;;  %s2737_s24 = scalar_lea.hbm %s3617_s16, 128 }
 0x9b5   : > { %p2734_p6 = scmp.ne.s32.totalorder %s3498_s4, %s2733_s3  ;;  %p2738_p9 = scmp.lt.u32.totalorder %s3498_s4, %s3617_s16 }
 0x9b6   : > { %p2739_p0 = scmp.lt.u32.totalorder %s2737_s24, %s2733_s3  ;;  %p2741_p12 = scmp.lt.u32.totalorder %s2733_s3, %s3498_s4 }
 0x9b7   : > { %p2735_p13 = pnand %p2734_p6, %p3618_p2 }
 0x9b8   : > { %p2740_p7 = por %p2739_p0, %p2738_p9 }
 0x9b9   : > { %p2736_p4 = pneg %p2735_p13 }
 0x9ba   : > { %p2742_p10 = por %p2741_p12, %p2740_p7 }
 0x9bc   : > { %p2743_p1 = pnand %p2742_p10, %p2736_p4 }
 0x9be   : > { %2746 = shalt.err (!%p2743_p1)
}
 0x9bf   : > { %2220 = dma.vmem_to_hbm [thread:$0]  (%p3618_p2), %s3500_s28, 64, %s3498_s4, %s1794_s5  }
 0x9c0 PF: > { %s1820_s19 = sand.u32 1, %s2809_s21   ;;  %p3619_p5 = scmp.ne.s32.totalorder %s3595_s30, 0 }
 0x9c1   : > { %p3620_p8 = scmp.ge.s32.totalorder %s2829_s26, 2  ;;  %s1821_s13 = scalar_lea.sflag [#allocation6], %s1820_s19 }
 0x9c3   : > { %p2261_p3 = pnand %p3620_p8, %p3619_p5 }
 0x9c5   : > { %2804 = dma.done.wait (!%p2261_p3), %s1821_s13, 64  }
 0x9c6   : > { %2806 = vsyncadd (!%p2261_p3), %s1821_s13, 4294967232  ;;  %s36_s26 = sadd.s32 1, %s2829_s26   ;;  %s3621_s21 = smov %s2813_s22 }
 0x9c7   : > { %p33_p11 = scmp.ge.s32.totalorder %s36_s26, 4   ;;  %s3622_s22 = smov %s2817_s23 }
 0x9c8   : > { %s3623_s23 = smov %s3216_s12  ;;  %s3624_s24 = smov %s2825_s25 }
 0x9c9   : > { %s3625_s25 = smov %s3627_s2  ;;  %35 = sbr.rel (!%p33_p11) target bundleno = 22 (0x16), region = 170 }
 0x9d0   :  { %1826 = vsyncpa [#allocation5], 1 }
 0x9d1   :  { %1828 = vsyncpa [#allocation5 + $0x1], 1 }
 0x9d2   :  { %1829 = vsyncpa [#allocation8], 1 }
 0x9d3   :  { %1831 = vsyncpa [#allocation8 + $0x1], 1 }
 0x9d4   :  { %1832 = vsyncpa [#allocation11], 1 }
 0x9d5   :  { %1833 = vsyncpa [#allocation14], 1 }
 0x9d6   :  { %1834 = vsyncpa [#allocation17], 1 }
 0x9d7   :  { %1835 = vsyncpa [#allocation20], 1 }
 0x9d8   :  { %1836 = vsyncpa [#allocation23], 1 }
 0x9d9   :  { %1837 = vsyncpa [#allocation6], 1 }
 0x9da   :  { %1839 = vsyncpa [#allocation6 + $0x1], 1 }

</bundles_post_ra>
